<compile_context>
chip_gen: v5e
topology: v5e:2x2
jax: 0.10.0
libtpu: 0.0.40
codegen_flags: <defaults>
</compile_context>

<pallas_src>
import jax
import jax.numpy as jnp
from jax import lax
from jax.experimental import pallas as pl
from jax.experimental.pallas import tpu as pltpu

_LANE = 128
_SUBLANE = 8


def _round_up(x, m):
    return ((x + m - 1) // m) * m


def _logreg_kernel(x_ref, w_ref, b_ref, o_ref):
    # x_ref: (TB, F) streamed batch tile (VMEM)
    # w_ref: (1, F)  weight row (VMEM, resident across the grid)
    # b_ref: (1,)    bias scalar (SMEM)
    # o_ref: (1, TB) lane-dense output row (batch mapped onto lanes)
    #
    # Contract the feature dim of the small (1, F) weight row against the
    # feature dim of the big (TB, F) tile.  The result lands directly in the
    # lane-dense (1, TB) layout; the streamed x operand is never transposed.
    # (If a bundle dump ever shows a vxpose/relayout of x, restructure the
    # contraction rather than transposing the big operand.)
    z = lax.dot_general(
        w_ref[...], x_ref[...],
        dimension_numbers=(((1,), (1,)), ((), ())),   # contract feature dims
        preferred_element_type=jnp.float32,
    )                                                 # -> (1, TB)
    z = z + b_ref[0]                                  # scalar bias from SMEM
    o_ref[...] = jax.nn.sigmoid(z).astype(o_ref.dtype)


def _tpu_topology():
    """Best-effort (VMEM capacity bytes, TensorCores per chip)."""
    vmem_cap = 64 * 1024 * 1024   # conservative default: v7x per-TC capacity
    num_tc = 1
    try:
        info = pltpu.get_tpu_info()
        vmem_cap = int(getattr(info, "vmem_capacity_bytes", vmem_cap))
        for attr in ("num_cores", "core_count", "tensorcores_per_chip"):
            v = getattr(info, attr, None)
            if v:
                num_tc = int(v)
                break
    except Exception:
        pass
    try:
        kind = jax.devices()[0].device_kind.lower()
        if any(tag in kind for tag in ("v4", "v5p", "7x", "v7")):
            num_tc = max(num_tc, 2)
    except Exception:
        pass
    return max(vmem_cap, 32 * 1024 * 1024), max(num_tc, 1)


def _pick_batch_tile(n_rows, n_features, itemsize, num_tc):
    """Lane-multiple batch tile chosen against a per-step byte target."""
    f_pad = _round_up(n_features, _LANE)
    row_bytes = f_pad * itemsize                 # VMEM bytes per lane-padded x row

    # ~4 MiB of x per grid step (8 MiB double-buffered): per the measured
    # tile-size table this reaches ~85% of HBM roofline while the fixed
    # ~0.35 us per-step overhead stays negligible.
    step_target = 4 * 1024 * 1024
    tb = max(_LANE, (step_target // row_bytes) // _LANE * _LANE)

    # Hard clamp: keep the double-buffered padded x stream <= ~24 MiB so it
    # fits v7x's 64 MiB physical VMEM (and the 32 MiB scoped limit we request).
    stream_budget = 24 * 1024 * 1024
    tb_budget = max(_LANE, (stream_budget // (2 * row_bytes)) // _LANE * _LANE)
    tb = min(tb, tb_budget)

    # No bigger than the (lane-padded) batch itself.
    n_pad_min = _round_up(n_rows, _LANE)
    tb = min(tb, n_pad_min)

    # Megacore split only on multi-TC parts: give each core >= 2 pipelined
    # steps when there is enough work.  On single-TC v5e/v6e the grid is a
    # serial loop, so splitting would just add per-step overhead.
    if num_tc >= 2 and n_pad_min >= 2 * num_tc * _LANE:
        per_step = max(_LANE, _round_up(pl.cdiv(n_rows, 2 * num_tc), _LANE))
        tb = min(tb, per_step)

    # TODO(synk): for F << 128 in production, pack 128//F samples per lane row
    # in the wrapper (segmented lane reduce via pltpu.roll) to restore
    # full-width DMA rows instead of streaming lane-padded 32-wide rows.
    return tb


def logistic_regression(x, w, b, *, batch_tile=None, force_pallas=False):
    """Forward of LogisticRegresion: sigmoid(x @ w.T + b).

    x: (N, F). w: nn.Linear weight (1, F) (also accepts (F, 1)/(F,)).
    b: nn.Linear bias (1,) (or scalar). Returns (N, 1) float32.
    """
    N, F = x.shape
    w_row = jnp.asarray(w).reshape(1, F).astype(x.dtype)
    b_vec = jnp.asarray(b, jnp.float32).reshape(1)
    itemsize = jnp.dtype(x.dtype).itemsize

    # Small-N fast path: padded workload is tiny, so the pallas_call launch and
    # pipeline prologue/epilogue dominate; a fused XLA expression is faster.
    padded_x_bytes = _round_up(N, _LANE) * F * itemsize
    if not force_pallas and batch_tile is None and padded_x_bytes < 128 * 1024:
        z = jnp.dot(x, w_row.T, precision=lax.Precision.HIGHEST,
                    preferred_element_type=jnp.float32) + b_vec
        return jax.nn.sigmoid(z).astype(jnp.float32)

    vmem_cap, num_tc = _tpu_topology()

    if batch_tile is None:
        batch_tile = _pick_batch_tile(N, F, itemsize, num_tc)
    batch_tile = max(_LANE, _round_up(int(batch_tile), _LANE))

    grid_len = pl.cdiv(N, batch_tile)
    # On multi-TC parts keep the parallel axis a multiple of the core count so
    # both TensorCores get equal, pipelined work (single best-effort pass).
    if num_tc >= 2 and grid_len > 1 and grid_len % num_tc != 0:
        grid_len2 = _round_up(grid_len, num_tc)
        batch_tile = max(_LANE, _round_up(pl.cdiv(N, grid_len2), _LANE))
        grid_len = pl.cdiv(N, batch_tile)

    n_pad = grid_len * batch_tile
    x_p = x if n_pad == N else jnp.pad(x, ((0, n_pad - N), (0, 0)))

    # VMEM footprint with lane/sublane padding; x stream is double-buffered.
    f_pad = _round_up(F, _LANE)
    est_bytes = (2 * batch_tile * f_pad * itemsize          # x tiles (2 buffers)
                 + 2 * _SUBLANE * f_pad * itemsize          # resident weight row
                 + 2 * _SUBLANE * batch_tile * 4)           # (1, TB) f32 output block
    vmem_limit = int(min(vmem_cap,
                         max(32 * 1024 * 1024, est_bytes + 4 * 1024 * 1024)))

    # Advisory cost: tells XLA this custom call is HBM-bound.
    cost = pl.CostEstimate(
        flops=2 * N * F,
        transcendentals=N,
        bytes_accessed=N * F * itemsize + F * itemsize + N * 4,
    )

    # TODO(synk): A/B pipeline_mode=pl.Buffered(3) on the x BlockSpec on v7x
    # (budget one extra tile of VMEM) to keep DMAs strictly back-to-back.
    # TODO(synk): for very large F add a K ("arbitrary") grid axis with an f32
    # VMEM accumulator so F need not fit in VMEM next to the batch tile.
    out = pl.pallas_call(
        _logreg_kernel,
        out_shape=jax.ShapeDtypeStruct((grid_len, batch_tile), jnp.float32),
        grid_spec=pltpu.PrefetchScalarGridSpec(
            num_scalar_prefetch=0,
            grid=(grid_len,),
            in_specs=[
                pl.BlockSpec((batch_tile, F), lambda i: (i, 0)),     # streamed x tile
                pl.BlockSpec((1, F), lambda i: (0, 0)),              # resident weight row
                pl.BlockSpec(memory_space=pltpu.MemorySpace.SMEM),   # bias scalar
            ],
            out_specs=pl.BlockSpec((1, batch_tile), lambda i: (i, 0)),
        ),
        compiler_params=pltpu.CompilerParams(
            dimension_semantics=("parallel",),
            vmem_limit_bytes=vmem_limit,
        ),
        cost_estimate=cost,
    )(x_p, w_row, b_vec)

    # Lane-dense (grid_len, batch_tile) -> (N, 1); row-major flatten preserves
    # sample order, padded rows are sliced off.  Pure wrapper layout plumbing.
    return out.reshape(n_pad, 1)[:N]


if __name__ == "__main__":
    key = jax.random.PRNGKey(0)
    kx, kw, kb, kx2 = jax.random.split(key, 4)

    F = 32  # n_input_features
    bound = 1.0 / (F ** 0.5)
    # nn.Linear(F, 1)-style parameters: weight (1, F), bias (1,)
    w = jax.random.uniform(kw, (1, F), minval=-bound, maxval=bound, dtype=jnp.float32)
    b = jax.random.uniform(kb, (1,), minval=-bound, maxval=bound, dtype=jnp.float32)

    def ref(x_):
        return jax.nn.sigmoid(jnp.dot(x_, w.T, precision=lax.Precision.HIGHEST) + b)

    # (1) Tiny batch (the module's typical use): small-N fast path.
    x_small = jax.random.normal(kx, (16, F), dtype=jnp.float32)
    y_small = jax.block_until_ready(logistic_regression(x_small, w, b))
    assert y_small.shape == (16, 1)
    assert jnp.allclose(y_small, ref(x_small), atol=1e-5, rtol=1e-5), (
        f"fast-path max err {float(jnp.max(jnp.abs(y_small - ref(x_small))))}")

    # (2) Pallas path with the auto-picked (byte-targeted) batch tile.
    x_big = jax.random.normal(kx2, (2048, F), dtype=jnp.float32)
    y_big = jax.block_until_ready(logistic_regression(x_big, w, b, force_pallas=True))
    assert y_big.shape == (2048, 1)
    assert jnp.allclose(y_big, ref(x_big), atol=5e-5, rtol=1e-4), (
        f"pallas max err {float(jnp.max(jnp.abs(y_big - ref(x_big))))}")

    # (3) Pallas path with a multi-step grid (explicit tile) + batch padding.
    x_odd = x_big[:2000]
    y_tiled = jax.block_until_ready(logistic_regression(x_odd, w, b, batch_tile=512))
    assert y_tiled.shape == (2000, 1)
    assert jnp.allclose(y_tiled, ref(x_odd), atol=5e-5, rtol=1e-4), (
        f"tiled max err {float(jnp.max(jnp.abs(y_tiled - ref(x_odd))))}")

    print("KERNEL_OK")
</pallas_src>

<mosaic_0001>
module attributes {stable_mosaic.version = 11 : i64} {
  func.func @_logreg_kernel(%arg0: i32, %arg1: memref<2048x32xf32, #tpu.memory_space<vmem>>, %arg2: memref<1x32xf32, #tpu.memory_space<vmem>>, %arg3: memref<1xf32, #tpu.memory_space<smem>>, %arg4: memref<1x2048xf32, #tpu.memory_space<vmem>>) attributes {dimension_semantics = [#tpu.dimension_semantics<parallel>], iteration_bounds = array<i64: 1>, scalar_prefetch = 0 : i64, scratch_operands = 0 : i64, tpu.core_type = #tpu.core_type<tc>, window_params = [{transform_indices = @transform_0, window_bounds = array<i64: 2048, 32>}, {pipeline_mode = #tpu.pipeline_mode<synchronous>, transform_indices = @transform_1, window_bounds = array<i64: 1, 32>}, {transform_indices = @transform_2, window_bounds = array<i64: 1>}, {transform_indices = @transform_3, window_bounds = array<i64: 1, 2048>}]} {
    %c0 = arith.constant 0 : index
    %c0_0 = arith.constant 0 : index
    %0 = vector.load %arg2[%c0, %c0_0] : memref<1x32xf32, #tpu.memory_space<vmem>>, vector<1x32xf32>
    %c0_1 = arith.constant 0 : index
    %c0_2 = arith.constant 0 : index
    %1 = vector.load %arg1[%c0_1, %c0_2] : memref<2048x32xf32, #tpu.memory_space<vmem>>, vector<2048x32xf32>
    %cst = arith.constant dense<0.000000e+00> : vector<1x2048xf32>
    %2 = tpu.matmul %0, %1, %cst {dimension_numbers = #tpu.dot_dimension_numbers<[1], [1], [0], [0], [0, 0, 1, 0], [], []>} : vector<1x32xf32>, vector<2048x32xf32>, vector<1x2048xf32> -> vector<1x2048xf32>
    %c0_3 = arith.constant 0 : index
    %3 = memref.load %arg3[%c0_3] : memref<1xf32, #tpu.memory_space<smem>>
    %4 = vector.broadcast %3 : f32 to vector<1x2048xf32>
    %5 = arith.addf %2, %4 : vector<1x2048xf32>
    %6 = arith.negf %5 : vector<1x2048xf32>
    %7 = math.exp %6 : vector<1x2048xf32>
    %cst_4 = arith.constant 1.000000e+00 : f32
    %8 = vector.broadcast %cst_4 : f32 to vector<1x2048xf32>
    %9 = arith.addf %8, %7 : vector<1x2048xf32>
    %10 = arith.divf %8, %9 : vector<1x2048xf32>
    %c0_5 = arith.constant 0 : index
    %c0_6 = arith.constant 0 : index
    %11 = vector.load %arg4[%c0_5, %c0_6] : memref<1x2048xf32, #tpu.memory_space<vmem>>, vector<1x2048xf32>
    tpu.vector_store %arg4[%c0_5, %c0_6], %10 {strides = array<i32>} : memref<1x2048xf32, #tpu.memory_space<vmem>>, vector<1x2048xf32>,
    return
  }
  func.func @transform_0(%arg0: i32) -> (i32, i32) {
    %c0_i32 = arith.constant 0 : i32
    %c0_i32_0 = arith.constant 0 : i32
    return %arg0, %c0_i32 : i32, i32
  }
  func.func @transform_1(%arg0: i32) -> (i32, i32) {
    %c0_i32 = arith.constant 0 : i32
    %c0_i32_0 = arith.constant 0 : i32
    %c0_i32_1 = arith.constant 0 : i32
    return %c0_i32, %c0_i32_0 : i32, i32
  }
  func.func @transform_2(%arg0: i32) -> i32 {
    %c0_i32 = arith.constant 0 : i32
    %c0_i32_0 = arith.constant 0 : i32
    return %c0_i32 : i32
  }
  func.func @transform_3(%arg0: i32) -> (i32, i32) {
    %c0_i32 = arith.constant 0 : i32
    %c0_i32_0 = arith.constant 0 : i32
    return %arg0, %c0_i32 : i32, i32
  }
}

</mosaic_0001>

<bundles_post_ra>
// kernel: tpu_custom_call.1
= control target key start
LH: loop header
LB: loop body
LE: loop exit
PB: predicated region body
PF: predicated region fallthrough
CT: control target
= control target key end

     0   :  { %vm275_vm0 = vcmask 261120   ;;  %s3584_s0 = inlined_call_operand.vmem [shape: f32[2048,32], index: 0, kind: input, shape index: {}]   ;;  %s3585_s1 = inlined_call_operand.vmem [shape: f32[1,32], index: 1, kind: input, shape index: {}]   ;;  %s3586_s2 = inlined_call_operand.<no memory space> [shape: f32[1], index: 2, kind: input, shape index: {}]   ;;  %s3587_s3 = inlined_call_operand.hbm [shape: f32[1,2048], index: 3, kind: output, shape index: {}]  }
   0x1   :  { %v32_v0 = vld [vmem:[%s3584_s0 + $0x78] sm:$0xff]  ;;  %v31_v4 = vld [vmem:[%s3584_s0 + $0x70] sm:$0xff]  ;;  %v30_v8 = vld [vmem:[%s3584_s0 + $0x68] sm:$0xff] }
   0x2   :  { %v48_v1 = vld [vmem:[%s3584_s0 + $0xf8] sm:$0xff]  ;;  %1742 = vmatpush.xpose.msk.msra.mxu0 %vm275_vm0, %v32_v0  ;;  %v47_v5 = vld [vmem:[%s3584_s0 + $0xf0] sm:$0xff]  ;;  %v46_v9 = vld [vmem:[%s3584_s0 + $0xe8] sm:$0xff] }
   0x3   :  { %v64_v2 = vld [vmem:[%s3584_s0 + $0x178] sm:$0xff]  ;;  %1759 = vmatpush.xpose.msk.msra.mxu1 %vm275_vm0, %v48_v1  ;;  %v63_v6 = vld [vmem:[%s3584_s0 + $0x170] sm:$0xff]  ;;  %v62_v10 = vld [vmem:[%s3584_s0 + $0x168] sm:$0xff] }
   0x4   :  { %v80_v3 = vld [vmem:[%s3584_s0 + $0x1f8] sm:$0xff]  ;;  %1776 = vmatpush.xpose.msk.msra.mxu2 %vm275_vm0, %v64_v2  ;;  %v79_v7 = vld [vmem:[%s3584_s0 + $0x1f0] sm:$0xff]  ;;  %v78_v11 = vld [vmem:[%s3584_s0 + $0x1e8] sm:$0xff] }
   0x5   :  { %1793 = vmatpush.xpose.msk.msra.mxu3 %vm275_vm0, %v80_v3  ;;  %v29_v12 = vld [vmem:[%s3584_s0 + $0x60] sm:$0xff]  ;;  %v28_v16 = vld [vmem:[%s3584_s0 + $0x58] sm:$0xff] }
   0x6   :  { %1743 = vmatpush.xpose.msk.msra.mxu0 %vm275_vm0, %v31_v4  ;;  %v45_v13 = vld [vmem:[%s3584_s0 + $0xe0] sm:$0xff]  ;;  %v44_v17 = vld [vmem:[%s3584_s0 + $0xd8] sm:$0xff] }
   0x7   :  { %1760 = vmatpush.xpose.msk.msra.mxu1 %vm275_vm0, %v47_v5  ;;  %v61_v14 = vld [vmem:[%s3584_s0 + $0x160] sm:$0xff]  ;;  %v60_v18 = vld [vmem:[%s3584_s0 + $0x158] sm:$0xff] }
   0x8   :  { %1777 = vmatpush.xpose.msk.msra.mxu2 %vm275_vm0, %v63_v6  ;;  %v77_v15 = vld [vmem:[%s3584_s0 + $0x1e0] sm:$0xff]  ;;  %v76_v19 = vld [vmem:[%s3584_s0 + $0x1d8] sm:$0xff] }
   0x9   :  { %1794 = vmatpush.xpose.msk.msra.mxu3 %vm275_vm0, %v79_v7 }
   0xa   :  { %1744 = vmatpush.xpose.msk.msra.mxu0 %vm275_vm0, %v30_v8 }
   0xb   :  { %1761 = vmatpush.xpose.msk.msra.mxu1 %vm275_vm0, %v46_v9 }
   0xc   :  { %1778 = vmatpush.xpose.msk.msra.mxu2 %vm275_vm0, %v62_v10 }
   0xd   :  { %1795 = vmatpush.xpose.msk.msra.mxu3 %vm275_vm0, %v78_v11 }
   0xe   :  { %1745 = vmatpush.xpose.msk.msra.mxu0 %vm275_vm0, %v29_v12 }
   0xf   :  { %1762 = vmatpush.xpose.msk.msra.mxu1 %vm275_vm0, %v45_v13 }
  0x10   :  { %1779 = vmatpush.xpose.msk.msra.mxu2 %vm275_vm0, %v61_v14 }
  0x11   :  { %1796 = vmatpush.xpose.msk.msra.mxu3 %vm275_vm0, %v77_v15 }
  0x12   :  { %9 = vsyncpa [#allocation4], 0  ;;  %1746 = vmatpush.xpose.msk.msra.mxu0 %vm275_vm0, %v28_v16  ;;  %v27_v20 = vld [vmem:[%s3584_s0 + $0x50] sm:$0xff]  ;;  %v26_v24 = vld [vmem:[%s3584_s0 + $0x48] sm:$0xff]  ;;  %s1733_s30 = sshll.u32 %s3587_s3, 4  ;;  %s1734_s30 = int_to_ptr.hbm [resolvable:$true] %s1733_s30 }
  0x13   :  { %1763 = vmatpush.xpose.msk.msra.mxu1 %vm275_vm0, %v44_v17  ;;  %v43_v21 = vld [vmem:[%s3584_s0 + $0xd0] sm:$0xff]  ;;  %v42_v25 = vld [vmem:[%s3584_s0 + $0xc8] sm:$0xff]  ;;  %v25_v28 = vld [vmem:[%s3584_s0 + $0x40] sm:$0xff] }
  0x14   :  { %1780 = vmatpush.xpose.msk.msra.mxu2 %vm275_vm0, %v60_v18  ;;  %v59_v22 = vld [vmem:[%s3584_s0 + $0x150] sm:$0xff]  ;;  %v58_v26 = vld [vmem:[%s3584_s0 + $0x148] sm:$0xff]  ;;  %v41_v29 = vld [vmem:[%s3584_s0 + $0xc0] sm:$0xff] }
  0x15   :  { %1797 = vmatpush.xpose.msk.msra.mxu3 %vm275_vm0, %v76_v19  ;;  %v75_v23 = vld [vmem:[%s3584_s0 + $0x1d0] sm:$0xff]  ;;  %v74_v27 = vld [vmem:[%s3584_s0 + $0x1c8] sm:$0xff]  ;;  %v57_v30 = vld [vmem:[%s3584_s0 + $0x140] sm:$0xff] }
  0x16   :  { %1747 = vmatpush.xpose.msk.msra.mxu0 %vm275_vm0, %v27_v20  ;;  %v73_v31 = vld [vmem:[%s3584_s0 + $0x1c0] sm:$0xff]  ;;  %v24_v32 = vld [vmem:[%s3584_s0 + $0x38] sm:$0xff]  ;;  %v23_v36 = vld [vmem:[%s3584_s0 + $0x30] sm:$0xff] }
  0x17   :  { %1764 = vmatpush.xpose.msk.msra.mxu1 %vm275_vm0, %v43_v21  ;;  %v40_v33 = vld [vmem:[%s3584_s0 + $0xb8] sm:$0xff]  ;;  %v39_v37 = vld [vmem:[%s3584_s0 + $0xb0] sm:$0xff]  ;;  %v22_v40 = vld [vmem:[%s3584_s0 + $0x28] sm:$0xff] }
  0x18   :  { %1781 = vmatpush.xpose.msk.msra.mxu2 %vm275_vm0, %v59_v22  ;;  %v56_v34 = vld [vmem:[%s3584_s0 + $0x138] sm:$0xff]  ;;  %v55_v38 = vld [vmem:[%s3584_s0 + $0x130] sm:$0xff]  ;;  %v38_v41 = vld [vmem:[%s3584_s0 + $0xa8] sm:$0xff] }
  0x19   :  { %1798 = vmatpush.xpose.msk.msra.mxu3 %vm275_vm0, %v75_v23  ;;  %v72_v35 = vld [vmem:[%s3584_s0 + $0x1b8] sm:$0xff]  ;;  %v71_v39 = vld [vmem:[%s3584_s0 + $0x1b0] sm:$0xff]  ;;  %v54_v42 = vld [vmem:[%s3584_s0 + $0x128] sm:$0xff] }
  0x1a   :  { %1748 = vmatpush.xpose.msk.msra.mxu0 %vm275_vm0, %v26_v24  ;;  %v70_v43 = vld [vmem:[%s3584_s0 + $0x1a8] sm:$0xff]  ;;  %v21_v44 = vld [vmem:[%s3584_s0 + $0x20] sm:$0xff]  ;;  %v20_v48 = vld [vmem:[%s3584_s0 + $0x18] sm:$0xff] }
  0x1b   :  { %1765 = vmatpush.xpose.msk.msra.mxu1 %vm275_vm0, %v42_v25  ;;  %v37_v45 = vld [vmem:[%s3584_s0 + $0xa0] sm:$0xff]  ;;  %v36_v49 = vld [vmem:[%s3584_s0 + $0x98] sm:$0xff]  ;;  %v19_v52 = vld [vmem:[%s3584_s0 + $0x10] sm:$0xff] }
  0x1c   :  { %1782 = vmatpush.xpose.msk.msra.mxu2 %vm275_vm0, %v58_v26  ;;  %v53_v46 = vld [vmem:[%s3584_s0 + $0x120] sm:$0xff]  ;;  %v52_v50 = vld [vmem:[%s3584_s0 + $0x118] sm:$0xff]  ;;  %v35_v53 = vld [vmem:[%s3584_s0 + $0x90] sm:$0xff] }
  0x1d   :  { %1799 = vmatpush.xpose.msk.msra.mxu3 %vm275_vm0, %v74_v27  ;;  %v69_v47 = vld [vmem:[%s3584_s0 + $0x1a0] sm:$0xff]  ;;  %v68_v51 = vld [vmem:[%s3584_s0 + $0x198] sm:$0xff]  ;;  %v51_v54 = vld [vmem:[%s3584_s0 + $0x110] sm:$0xff] }
  0x1e   :  { %1749 = vmatpush.xpose.msk.msra.mxu0 %vm275_vm0, %v25_v28  ;;  %v67_v55 = vld [vmem:[%s3584_s0 + $0x190] sm:$0xff]  ;;  %v18_v56 = vld [vmem:[%s3584_s0 + $0x8] sm:$0xff]  ;;  %v17_v60 = vld [vmem:[%s3584_s0] sm:$0xff] }
  0x1f   :  { %1766 = vmatpush.xpose.msk.msra.mxu1 %vm275_vm0, %v41_v29  ;;  %v34_v57 = vld [vmem:[%s3584_s0 + $0x88] sm:$0xff]  ;;  %v33_v61 = vld [vmem:[%s3584_s0 + $0x80] sm:$0xff]  ;;  %v96_v0 = vld [vmem:[%s3584_s0 + $0x278] sm:$0xff] }
  0x20   :  { %1783 = vmatpush.xpose.msk.msra.mxu2 %vm275_vm0, %v57_v30  ;;  %v50_v58 = vld [vmem:[%s3584_s0 + $0x108] sm:$0xff]  ;;  %v49_v62 = vld [vmem:[%s3584_s0 + $0x100] sm:$0xff]  ;;  %v112_v1 = vld [vmem:[%s3584_s0 + $0x2f8] sm:$0xff] }
  0x21   :  { %1800 = vmatpush.xpose.msk.msra.mxu3 %vm275_vm0, %v73_v31  ;;  %v66_v59 = vld [vmem:[%s3584_s0 + $0x188] sm:$0xff]  ;;  %v65_v63 = vld [vmem:[%s3584_s0 + $0x180] sm:$0xff]  ;;  %v128_v2 = vld [vmem:[%s3584_s0 + $0x378] sm:$0xff] }
  0x22   :  { %1750 = vmatpush.xpose.msk.msra.mxu0 %vm275_vm0, %v24_v32  ;;  %v144_v3 = vld [vmem:[%s3584_s0 + $0x3f8] sm:$0xff]  ;;  %v95_v4 = vld [vmem:[%s3584_s0 + $0x270] sm:$0xff]  ;;  %v94_v8 = vld [vmem:[%s3584_s0 + $0x268] sm:$0xff] }
  0x23   :  { %1767 = vmatpush.xpose.msk.msra.mxu1 %vm275_vm0, %v40_v33  ;;  %v111_v5 = vld [vmem:[%s3584_s0 + $0x2f0] sm:$0xff]  ;;  %v110_v9 = vld [vmem:[%s3584_s0 + $0x2e8] sm:$0xff]  ;;  %v93_v12 = vld [vmem:[%s3584_s0 + $0x260] sm:$0xff] }
  0x24   :  { %1784 = vmatpush.xpose.msk.msra.mxu2 %vm275_vm0, %v56_v34  ;;  %v127_v6 = vld [vmem:[%s3584_s0 + $0x370] sm:$0xff]  ;;  %v126_v10 = vld [vmem:[%s3584_s0 + $0x368] sm:$0xff]  ;;  %v109_v13 = vld [vmem:[%s3584_s0 + $0x2e0] sm:$0xff] }
  0x25   :  { %1801 = vmatpush.xpose.msk.msra.mxu3 %vm275_vm0, %v72_v35  ;;  %v143_v7 = vld [vmem:[%s3584_s0 + $0x3f0] sm:$0xff]  ;;  %v142_v11 = vld [vmem:[%s3584_s0 + $0x3e8] sm:$0xff]  ;;  %v125_v14 = vld [vmem:[%s3584_s0 + $0x360] sm:$0xff] }
  0x26   :  { %1751 = vmatpush.xpose.msk.msra.mxu0 %vm275_vm0, %v23_v36  ;;  %v141_v15 = vld [vmem:[%s3584_s0 + $0x3e0] sm:$0xff]  ;;  %v92_v16 = vld [vmem:[%s3584_s0 + $0x258] sm:$0xff]  ;;  %v91_v21 = vld [vmem:[%s3584_s0 + $0x250] sm:$0xff] }
  0x27   :  { %1768 = vmatpush.xpose.msk.msra.mxu1 %vm275_vm0, %v39_v37  ;;  %v108_v17 = vld [vmem:[%s3584_s0 + $0x2d8] sm:$0xff]  ;;  %v2471_v18 = vld [vmem:[%s3585_s1] sm:$0x1]  ;;  %v107_v22 = vld [vmem:[%s3584_s0 + $0x2d0] sm:$0xff] }
  0x28   :  { %1785 = vmatpush.xpose.msk.msra.mxu2 %vm275_vm0, %v55_v38  ;;  %v124_v19 = vld [vmem:[%s3584_s0 + $0x358] sm:$0xff]  ;;  %v123_v23 = vld [vmem:[%s3584_s0 + $0x350] sm:$0xff]  ;;  %v90_v25 = vld [vmem:[%s3584_s0 + $0x248] sm:$0xff] }
  0x29   :  { %1802 = vmatpush.xpose.msk.msra.mxu3 %vm275_vm0, %v71_v39  ;;  %v140_v20 = vld [vmem:[%s3584_s0 + $0x3d8] sm:$0xff]  ;;  %v139_v24 = vld [vmem:[%s3584_s0 + $0x3d0] sm:$0xff]  ;;  %v106_v26 = vld [vmem:[%s3584_s0 + $0x2c8] sm:$0xff] }
  0x2a   :  { %1752 = vmatpush.xpose.msk.msra.mxu0 %vm275_vm0, %v22_v40  ;;  %v122_v27 = vld [vmem:[%s3584_s0 + $0x348] sm:$0xff]  ;;  %v89_v29 = vld [vmem:[%s3584_s0 + $0x240] sm:$0xff]  ;;  %v88_v33 = vld [vmem:[%s3584_s0 + $0x238] sm:$0xff] }
  0x2b   :  { %1769 = vmatpush.xpose.msk.msra.mxu1 %vm275_vm0, %v38_v41  ;;  %v138_v28 = vld [vmem:[%s3584_s0 + $0x3c8] sm:$0xff]  ;;  %v105_v30 = vld [vmem:[%s3584_s0 + $0x2c0] sm:$0xff]  ;;  %v104_v34 = vld [vmem:[%s3584_s0 + $0x2b8] sm:$0xff] }
  0x2c   :  { %1786 = vmatpush.xpose.msk.msra.mxu2 %vm275_vm0, %v54_v42  ;;  %v121_v31 = vld [vmem:[%s3584_s0 + $0x340] sm:$0xff]  ;;  %v120_v35 = vld [vmem:[%s3584_s0 + $0x338] sm:$0xff]  ;;  %v87_v37 = vld [vmem:[%s3584_s0 + $0x230] sm:$0xff] }
  0x2d   :  { %1803 = vmatpush.xpose.msk.msra.mxu3 %vm275_vm0, %v70_v43  ;;  %v137_v32 = vld [vmem:[%s3584_s0 + $0x3c0] sm:$0xff]  ;;  %v136_v36 = vld [vmem:[%s3584_s0 + $0x3b8] sm:$0xff]  ;;  %v103_v38 = vld [vmem:[%s3584_s0 + $0x2b0] sm:$0xff] }
  0x2e   :  { %1753 = vmatpush.xpose.msk.msra.mxu0 %vm275_vm0, %v21_v44  ;;  %v119_v39 = vld [vmem:[%s3584_s0 + $0x330] sm:$0xff]  ;;  %v86_v41 = vld [vmem:[%s3584_s0 + $0x228] sm:$0xff] }
  0x2f   :  { %1770 = vmatpush.xpose.msk.msra.mxu1 %vm275_vm0, %v37_v45  ;;  %v135_v40 = vld [vmem:[%s3584_s0 + $0x3b0] sm:$0xff]  ;;  %v102_v42 = vld [vmem:[%s3584_s0 + $0x2a8] sm:$0xff]  ;;  %v85_v45 = vld [vmem:[%s3584_s0 + $0x220] sm:$0xff] }
  0x30   :  { %1787 = vmatpush.xpose.msk.msra.mxu2 %vm275_vm0, %v53_v46  ;;  %v118_v43 = vld [vmem:[%s3584_s0 + $0x328] sm:$0xff]  ;;  %v101_v46 = vld [vmem:[%s3584_s0 + $0x2a0] sm:$0xff] }
  0x31   :  { %1804 = vmatpush.xpose.msk.msra.mxu3 %vm275_vm0, %v69_v47  ;;  %v134_v44 = vld [vmem:[%s3584_s0 + $0x3a8] sm:$0xff]  ;;  %v117_v47 = vld [vmem:[%s3584_s0 + $0x320] sm:$0xff] }
  0x32   :  { %1754 = vmatpush.xpose.msk.msra.mxu0 %vm275_vm0, %v20_v48  ;;  %v133_v48 = vld [vmem:[%s3584_s0 + $0x3a0] sm:$0xff] }
  0x33   :  { %1771 = vmatpush.xpose.msk.msra.mxu1 %vm275_vm0, %v36_v49  ;;  %v84_v49 = vld [vmem:[%s3584_s0 + $0x218] sm:$0xff] }
  0x34   :  { %1788 = vmatpush.xpose.msk.msra.mxu2 %vm275_vm0, %v52_v50  ;;  %v100_v50 = vld [vmem:[%s3584_s0 + $0x298] sm:$0xff] }
  0x35   :  { %1805 = vmatpush.xpose.msk.msra.mxu3 %vm275_vm0, %v68_v51  ;;  %v116_v51 = vld [vmem:[%s3584_s0 + $0x318] sm:$0xff] }
  0x36   :  { %1755 = vmatpush.xpose.msk.msra.mxu0 %vm275_vm0, %v19_v52  ;;  %v132_v52 = vld [vmem:[%s3584_s0 + $0x398] sm:$0xff] }
  0x37   :  { %1772 = vmatpush.xpose.msk.msra.mxu1 %vm275_vm0, %v35_v53  ;;  %v83_v53 = vld [vmem:[%s3584_s0 + $0x210] sm:$0xff] }
  0x38   :  { %1789 = vmatpush.xpose.msk.msra.mxu2 %vm275_vm0, %v51_v54  ;;  %v99_v54 = vld [vmem:[%s3584_s0 + $0x290] sm:$0xff] }
  0x39   :  { %1806 = vmatpush.xpose.msk.msra.mxu3 %vm275_vm0, %v67_v55  ;;  %v115_v55 = vld [vmem:[%s3584_s0 + $0x310] sm:$0xff] }
  0x3a   :  { %1756 = vmatpush.xpose.msk.msra.mxu0 %vm275_vm0, %v18_v56  ;;  %v131_v56 = vld [vmem:[%s3584_s0 + $0x390] sm:$0xff] }
  0x3b   :  { %1773 = vmatpush.xpose.msk.msra.mxu1 %vm275_vm0, %v34_v57  ;;  %v82_v57 = vld [vmem:[%s3584_s0 + $0x208] sm:$0xff] }
  0x3c   :  { %1790 = vmatpush.xpose.msk.msra.mxu2 %vm275_vm0, %v50_v58  ;;  %v98_v58 = vld [vmem:[%s3584_s0 + $0x288] sm:$0xff] }
  0x3d   :  { %1807 = vmatpush.xpose.msk.msra.mxu3 %vm275_vm0, %v66_v59  ;;  %v114_v59 = vld [vmem:[%s3584_s0 + $0x308] sm:$0xff] }
  0x3e   :  { %1757 = vmatpush.xpose.msk.msra.mxu0 %vm275_vm0, %v17_v60  ;;  %v130_v60 = vld [vmem:[%s3584_s0 + $0x388] sm:$0xff] }
  0x3f   :  { %1774 = vmatpush.xpose.msk.msra.mxu1 %vm275_vm0, %v33_v61  ;;  %v81_v61 = vld [vmem:[%s3584_s0 + $0x200] sm:$0xff] }
  0x40   :  { %1791 = vmatpush.xpose.msk.msra.mxu2 %vm275_vm0, %v49_v62  ;;  %v97_v62 = vld [vmem:[%s3584_s0 + $0x280] sm:$0xff] }
  0x41   :  { %1808 = vmatpush.xpose.msk.msra.mxu3 %vm275_vm0, %v65_v63  ;;  %1758 = vmatmul.msk.f32.vlgmr.msra.gmra.mxu0 %vm275_vm0, %v2471_v18  ;;  %v113_v63 = vld [vmem:[%s3584_s0 + $0x300] sm:$0xff] }
  0x42   :  { %1810 = vmatpush.xpose.msk.msrb.mxu0 %vm275_vm0, %v96_v0  ;;  %1775 = vmatmul.msk.f32.vlgmr.msra.gmra.mxu1 %vm275_vm0, %v2471_v18  ;;  %v129_v0 = vld [vmem:[%s3584_s0 + $0x380] sm:$0xff] }
  0x43   :  { %1827 = vmatpush.xpose.msk.msrb.mxu1 %vm275_vm0, %v112_v1  ;;  %1792 = vmatmul.msk.f32.vlgmr.msra.gmra.mxu2 %vm275_vm0, %v2471_v18  ;;  %v160_v1 = vld [vmem:[%s3584_s0 + $0x478] sm:$0xff] }
  0x44   :  { %1844 = vmatpush.xpose.msk.msrb.mxu2 %vm275_vm0, %v128_v2  ;;  %1809 = vmatmul.msk.f32.vlgmr.msra.gmra.mxu3 %vm275_vm0, %v2471_v18  ;;  %v176_v2 = vld [vmem:[%s3584_s0 + $0x4f8] sm:$0xff] }
  0x45   :  { %1861 = vmatpush.xpose.msk.msrb.mxu3 %vm275_vm0, %v144_v3  ;;  %v192_v3 = vld [vmem:[%s3584_s0 + $0x578] sm:$0xff] }
  0x46   :  { %1811 = vmatpush.xpose.msk.msrb.mxu0 %vm275_vm0, %v95_v4  ;;  %v208_v4 = vld [vmem:[%s3584_s0 + $0x5f8] sm:$0xff] }
  0x47   :  { %1828 = vmatpush.xpose.msk.msrb.mxu1 %vm275_vm0, %v111_v5  ;;  %v159_v5 = vld [vmem:[%s3584_s0 + $0x470] sm:$0xff] }
  0x48   :  { %1845 = vmatpush.xpose.msk.msrb.mxu2 %vm275_vm0, %v127_v6  ;;  %v175_v6 = vld [vmem:[%s3584_s0 + $0x4f0] sm:$0xff] }
  0x49   :  { %1862 = vmatpush.xpose.msk.msrb.mxu3 %vm275_vm0, %v143_v7  ;;  %v191_v7 = vld [vmem:[%s3584_s0 + $0x570] sm:$0xff] }
  0x4a   :  { %1812 = vmatpush.xpose.msk.msrb.mxu0 %vm275_vm0, %v94_v8  ;;  %v207_v8 = vld [vmem:[%s3584_s0 + $0x5f0] sm:$0xff] }
  0x4b   :  { %1829 = vmatpush.xpose.msk.msrb.mxu1 %vm275_vm0, %v110_v9  ;;  %v158_v9 = vld [vmem:[%s3584_s0 + $0x468] sm:$0xff] }
  0x4c   :  { %1846 = vmatpush.xpose.msk.msrb.mxu2 %vm275_vm0, %v126_v10  ;;  %v174_v10 = vld [vmem:[%s3584_s0 + $0x4e8] sm:$0xff] }
  0x4d   :  { %1863 = vmatpush.xpose.msk.msrb.mxu3 %vm275_vm0, %v142_v11  ;;  %v190_v11 = vld [vmem:[%s3584_s0 + $0x568] sm:$0xff] }
  0x4e   :  { %1813 = vmatpush.xpose.msk.msrb.mxu0 %vm275_vm0, %v93_v12  ;;  %v206_v12 = vld [vmem:[%s3584_s0 + $0x5e8] sm:$0xff] }
  0x4f   :  { %1830 = vmatpush.xpose.msk.msrb.mxu1 %vm275_vm0, %v109_v13  ;;  %v157_v13 = vld [vmem:[%s3584_s0 + $0x460] sm:$0xff] }
  0x50   :  { %1847 = vmatpush.xpose.msk.msrb.mxu2 %vm275_vm0, %v125_v14  ;;  %v173_v14 = vld [vmem:[%s3584_s0 + $0x4e0] sm:$0xff] }
  0x51   :  { %1864 = vmatpush.xpose.msk.msrb.mxu3 %vm275_vm0, %v141_v15  ;;  %v189_v15 = vld [vmem:[%s3584_s0 + $0x560] sm:$0xff] }
  0x52   :  { %1814 = vmatpush.xpose.msk.msrb.mxu0 %vm275_vm0, %v92_v16  ;;  %v205_v16 = vld [vmem:[%s3584_s0 + $0x5e0] sm:$0xff] }
  0x53   :  { %1831 = vmatpush.xpose.msk.msrb.mxu1 %vm275_vm0, %v108_v17  ;;  %v156_v17 = vld [vmem:[%s3584_s0 + $0x458] sm:$0xff] }
  0x54   :  { %1848 = vmatpush.xpose.msk.msrb.mxu2 %vm275_vm0, %v124_v19  ;;  %v172_v19 = vld [vmem:[%s3584_s0 + $0x4d8] sm:$0xff] }
  0x55   :  { %1865 = vmatpush.xpose.msk.msrb.mxu3 %vm275_vm0, %v140_v20  ;;  %v188_v20 = vld [vmem:[%s3584_s0 + $0x558] sm:$0xff] }
  0x56   :  { %1815 = vmatpush.xpose.msk.msrb.mxu0 %vm275_vm0, %v91_v21  ;;  %v204_v21 = vld [vmem:[%s3584_s0 + $0x5d8] sm:$0xff] }
  0x57   :  { %1832 = vmatpush.xpose.msk.msrb.mxu1 %vm275_vm0, %v107_v22  ;;  %v155_v22 = vld [vmem:[%s3584_s0 + $0x450] sm:$0xff] }
  0x58   :  { %1849 = vmatpush.xpose.msk.msrb.mxu2 %vm275_vm0, %v123_v23  ;;  %v171_v23 = vld [vmem:[%s3584_s0 + $0x4d0] sm:$0xff] }
  0x59   :  { %1866 = vmatpush.xpose.msk.msrb.mxu3 %vm275_vm0, %v139_v24  ;;  %v187_v24 = vld [vmem:[%s3584_s0 + $0x550] sm:$0xff] }
  0x5a   :  { %1816 = vmatpush.xpose.msk.msrb.mxu0 %vm275_vm0, %v90_v25  ;;  %v203_v25 = vld [vmem:[%s3584_s0 + $0x5d0] sm:$0xff] }
  0x5b   :  { %1833 = vmatpush.xpose.msk.msrb.mxu1 %vm275_vm0, %v106_v26  ;;  %v154_v26 = vld [vmem:[%s3584_s0 + $0x448] sm:$0xff] }
  0x5c   :  { %1850 = vmatpush.xpose.msk.msrb.mxu2 %vm275_vm0, %v122_v27  ;;  %v170_v27 = vld [vmem:[%s3584_s0 + $0x4c8] sm:$0xff] }
  0x5d   :  { %1867 = vmatpush.xpose.msk.msrb.mxu3 %vm275_vm0, %v138_v28  ;;  %v186_v28 = vld [vmem:[%s3584_s0 + $0x548] sm:$0xff] }
  0x5e   :  { %1817 = vmatpush.xpose.msk.msrb.mxu0 %vm275_vm0, %v89_v29  ;;  %v202_v29 = vld [vmem:[%s3584_s0 + $0x5c8] sm:$0xff] }
  0x5f   :  { %1834 = vmatpush.xpose.msk.msrb.mxu1 %vm275_vm0, %v105_v30  ;;  %v153_v30 = vld [vmem:[%s3584_s0 + $0x440] sm:$0xff] }
  0x60   :  { %1851 = vmatpush.xpose.msk.msrb.mxu2 %vm275_vm0, %v121_v31  ;;  %v169_v31 = vld [vmem:[%s3584_s0 + $0x4c0] sm:$0xff] }
  0x61   :  { %1868 = vmatpush.xpose.msk.msrb.mxu3 %vm275_vm0, %v137_v32  ;;  %v185_v32 = vld [vmem:[%s3584_s0 + $0x540] sm:$0xff] }
  0x62   :  { %1818 = vmatpush.xpose.msk.msrb.mxu0 %vm275_vm0, %v88_v33  ;;  %v201_v33 = vld [vmem:[%s3584_s0 + $0x5c0] sm:$0xff] }
  0x63   :  { %1835 = vmatpush.xpose.msk.msrb.mxu1 %vm275_vm0, %v104_v34  ;;  %v152_v34 = vld [vmem:[%s3584_s0 + $0x438] sm:$0xff] }
  0x64   :  { %1852 = vmatpush.xpose.msk.msrb.mxu2 %vm275_vm0, %v120_v35  ;;  %v168_v35 = vld [vmem:[%s3584_s0 + $0x4b8] sm:$0xff] }
  0x65   :  { %1869 = vmatpush.xpose.msk.msrb.mxu3 %vm275_vm0, %v136_v36  ;;  %v184_v36 = vld [vmem:[%s3584_s0 + $0x538] sm:$0xff] }
  0x66   :  { %1819 = vmatpush.xpose.msk.msrb.mxu0 %vm275_vm0, %v87_v37  ;;  %v200_v37 = vld [vmem:[%s3584_s0 + $0x5b8] sm:$0xff] }
  0x67   :  { %1836 = vmatpush.xpose.msk.msrb.mxu1 %vm275_vm0, %v103_v38  ;;  %v151_v38 = vld [vmem:[%s3584_s0 + $0x430] sm:$0xff] }
  0x68   :  { %1853 = vmatpush.xpose.msk.msrb.mxu2 %vm275_vm0, %v119_v39  ;;  %v167_v39 = vld [vmem:[%s3584_s0 + $0x4b0] sm:$0xff] }
  0x69   :  { %1870 = vmatpush.xpose.msk.msrb.mxu3 %vm275_vm0, %v135_v40  ;;  %v183_v40 = vld [vmem:[%s3584_s0 + $0x530] sm:$0xff] }
  0x6a   :  { %1820 = vmatpush.xpose.msk.msrb.mxu0 %vm275_vm0, %v86_v41  ;;  %v199_v41 = vld [vmem:[%s3584_s0 + $0x5b0] sm:$0xff] }
  0x6b   :  { %1837 = vmatpush.xpose.msk.msrb.mxu1 %vm275_vm0, %v102_v42  ;;  %v150_v42 = vld [vmem:[%s3584_s0 + $0x428] sm:$0xff] }
  0x6c   :  { %1854 = vmatpush.xpose.msk.msrb.mxu2 %vm275_vm0, %v118_v43  ;;  %v166_v43 = vld [vmem:[%s3584_s0 + $0x4a8] sm:$0xff] }
  0x6d   :  { %1871 = vmatpush.xpose.msk.msrb.mxu3 %vm275_vm0, %v134_v44  ;;  %v182_v44 = vld [vmem:[%s3584_s0 + $0x528] sm:$0xff] }
  0x6e   :  { %1821 = vmatpush.xpose.msk.msrb.mxu0 %vm275_vm0, %v85_v45  ;;  %v198_v45 = vld [vmem:[%s3584_s0 + $0x5a8] sm:$0xff] }
  0x6f   :  { %1838 = vmatpush.xpose.msk.msrb.mxu1 %vm275_vm0, %v101_v46  ;;  %v149_v46 = vld [vmem:[%s3584_s0 + $0x420] sm:$0xff] }
  0x70   :  { %1855 = vmatpush.xpose.msk.msrb.mxu2 %vm275_vm0, %v117_v47  ;;  %v165_v47 = vld [vmem:[%s3584_s0 + $0x4a0] sm:$0xff] }
  0x71   :  { %1872 = vmatpush.xpose.msk.msrb.mxu3 %vm275_vm0, %v133_v48  ;;  %v181_v48 = vld [vmem:[%s3584_s0 + $0x520] sm:$0xff] }
  0x72   :  { %1822 = vmatpush.xpose.msk.msrb.mxu0 %vm275_vm0, %v84_v49  ;;  %v197_v49 = vld [vmem:[%s3584_s0 + $0x5a0] sm:$0xff] }
  0x73   :  { %1839 = vmatpush.xpose.msk.msrb.mxu1 %vm275_vm0, %v100_v50  ;;  %v148_v50 = vld [vmem:[%s3584_s0 + $0x418] sm:$0xff] }
  0x74   :  { %1856 = vmatpush.xpose.msk.msrb.mxu2 %vm275_vm0, %v116_v51  ;;  %v164_v51 = vld [vmem:[%s3584_s0 + $0x498] sm:$0xff] }
  0x75   :  { %1873 = vmatpush.xpose.msk.msrb.mxu3 %vm275_vm0, %v132_v52  ;;  %v180_v52 = vld [vmem:[%s3584_s0 + $0x518] sm:$0xff] }
  0x76   :  { %1823 = vmatpush.xpose.msk.msrb.mxu0 %vm275_vm0, %v83_v53  ;;  %v196_v53 = vld [vmem:[%s3584_s0 + $0x598] sm:$0xff] }
  0x77   :  { %1840 = vmatpush.xpose.msk.msrb.mxu1 %vm275_vm0, %v99_v54  ;;  %v147_v54 = vld [vmem:[%s3584_s0 + $0x410] sm:$0xff] }
  0x78   :  { %1857 = vmatpush.xpose.msk.msrb.mxu2 %vm275_vm0, %v115_v55  ;;  %v163_v55 = vld [vmem:[%s3584_s0 + $0x490] sm:$0xff] }
  0x79   :  { %1874 = vmatpush.xpose.msk.msrb.mxu3 %vm275_vm0, %v131_v56  ;;  %v179_v56 = vld [vmem:[%s3584_s0 + $0x510] sm:$0xff] }
  0x7a   :  { %1824 = vmatpush.xpose.msk.msrb.mxu0 %vm275_vm0, %v82_v57  ;;  %v195_v57 = vld [vmem:[%s3584_s0 + $0x590] sm:$0xff] }
  0x7b   :  { %1841 = vmatpush.xpose.msk.msrb.mxu1 %vm275_vm0, %v98_v58  ;;  %v146_v58 = vld [vmem:[%s3584_s0 + $0x408] sm:$0xff] }
  0x7c   :  { %1858 = vmatpush.xpose.msk.msrb.mxu2 %vm275_vm0, %v114_v59  ;;  %v162_v59 = vld [vmem:[%s3584_s0 + $0x488] sm:$0xff] }
  0x7d   :  { %1875 = vmatpush.xpose.msk.msrb.mxu3 %vm275_vm0, %v130_v60  ;;  %v178_v60 = vld [vmem:[%s3584_s0 + $0x508] sm:$0xff] }
  0x7e   :  { %1825 = vmatpush.xpose.msk.msrb.mxu0 %vm275_vm0, %v81_v61  ;;  %v194_v61 = vld [vmem:[%s3584_s0 + $0x588] sm:$0xff] }
  0x7f   :  { %1842 = vmatpush.xpose.msk.msrb.mxu1 %vm275_vm0, %v97_v62  ;;  %v145_v62 = vld [vmem:[%s3584_s0 + $0x400] sm:$0xff] }
  0x80   :  { %1859 = vmatpush.xpose.msk.msrb.mxu2 %vm275_vm0, %v113_v63  ;;  %v161_v63 = vld [vmem:[%s3584_s0 + $0x480] sm:$0xff] }
  0x81   :  { %1876 = vmatpush.xpose.msk.msrb.mxu3 %vm275_vm0, %v129_v0  ;;  %1826 = vmatmul.msk.f32.vlgmr.msrb.gmra.mxu0 %vm275_vm0, %v2471_v18  ;;  %v177_v0 = vld [vmem:[%s3584_s0 + $0x500] sm:$0xff] }
  0x82   :  { %1878 = vmatpush.xpose.msk.msra.mxu0 %vm275_vm0, %v160_v1  ;;  %1843 = vmatmul.msk.f32.vlgmr.msrb.gmra.mxu1 %vm275_vm0, %v2471_v18  ;;  %v193_v1 = vld [vmem:[%s3584_s0 + $0x580] sm:$0xff] }
  0x83   :  { %1895 = vmatpush.xpose.msk.msra.mxu1 %vm275_vm0, %v176_v2  ;;  %1860 = vmatmul.msk.f32.vlgmr.msrb.gmra.mxu2 %vm275_vm0, %v2471_v18  ;;  %v224_v2 = vld [vmem:[%s3584_s0 + $0x678] sm:$0xff] }
  0x84   :  { %1912 = vmatpush.xpose.msk.msra.mxu2 %vm275_vm0, %v192_v3  ;;  %1877 = vmatmul.msk.f32.vlgmr.msrb.gmra.mxu3 %vm275_vm0, %v2471_v18  ;;  %v240_v3 = vld [vmem:[%s3584_s0 + $0x6f8] sm:$0xff] }
  0x85   :  { %1929 = vmatpush.xpose.msk.msra.mxu3 %vm275_vm0, %v208_v4  ;;  %v256_v4 = vld [vmem:[%s3584_s0 + $0x778] sm:$0xff] }
  0x86   :  { %1879 = vmatpush.xpose.msk.msra.mxu0 %vm275_vm0, %v159_v5  ;;  %v272_v5 = vld [vmem:[%s3584_s0 + $0x7f8] sm:$0xff] }
  0x87   :  { %1896 = vmatpush.xpose.msk.msra.mxu1 %vm275_vm0, %v175_v6  ;;  %v223_v6 = vld [vmem:[%s3584_s0 + $0x670] sm:$0xff] }
  0x88   :  { %1913 = vmatpush.xpose.msk.msra.mxu2 %vm275_vm0, %v191_v7  ;;  %v239_v7 = vld [vmem:[%s3584_s0 + $0x6f0] sm:$0xff] }
  0x89   :  { %1930 = vmatpush.xpose.msk.msra.mxu3 %vm275_vm0, %v207_v8  ;;  %v255_v8 = vld [vmem:[%s3584_s0 + $0x770] sm:$0xff] }
  0x8a   :  { %1880 = vmatpush.xpose.msk.msra.mxu0 %vm275_vm0, %v158_v9  ;;  %v271_v9 = vld [vmem:[%s3584_s0 + $0x7f0] sm:$0xff] }
  0x8b   :  { %1897 = vmatpush.xpose.msk.msra.mxu1 %vm275_vm0, %v174_v10  ;;  %v222_v10 = vld [vmem:[%s3584_s0 + $0x668] sm:$0xff] }
  0x8c   :  { %1914 = vmatpush.xpose.msk.msra.mxu2 %vm275_vm0, %v190_v11  ;;  %v238_v11 = vld [vmem:[%s3584_s0 + $0x6e8] sm:$0xff] }
  0x8d   :  { %1931 = vmatpush.xpose.msk.msra.mxu3 %vm275_vm0, %v206_v12  ;;  %v254_v12 = vld [vmem:[%s3584_s0 + $0x768] sm:$0xff] }
  0x8e   :  { %1881 = vmatpush.xpose.msk.msra.mxu0 %vm275_vm0, %v157_v13  ;;  %v270_v13 = vld [vmem:[%s3584_s0 + $0x7e8] sm:$0xff] }
  0x8f   :  { %1898 = vmatpush.xpose.msk.msra.mxu1 %vm275_vm0, %v173_v14  ;;  %v221_v14 = vld [vmem:[%s3584_s0 + $0x660] sm:$0xff] }
  0x90   :  { %1915 = vmatpush.xpose.msk.msra.mxu2 %vm275_vm0, %v189_v15  ;;  %v237_v15 = vld [vmem:[%s3584_s0 + $0x6e0] sm:$0xff] }
  0x91   :  { %1932 = vmatpush.xpose.msk.msra.mxu3 %vm275_vm0, %v205_v16  ;;  %v253_v16 = vld [vmem:[%s3584_s0 + $0x760] sm:$0xff] }
  0x92   :  { %1882 = vmatpush.xpose.msk.msra.mxu0 %vm275_vm0, %v156_v17  ;;  %v269_v17 = vld [vmem:[%s3584_s0 + $0x7e0] sm:$0xff] }
  0x93   :  { %1899 = vmatpush.xpose.msk.msra.mxu1 %vm275_vm0, %v172_v19  ;;  %v220_v19 = vld [vmem:[%s3584_s0 + $0x658] sm:$0xff] }
  0x94   :  { %1916 = vmatpush.xpose.msk.msra.mxu2 %vm275_vm0, %v188_v20  ;;  %v236_v20 = vld [vmem:[%s3584_s0 + $0x6d8] sm:$0xff] }
  0x95   :  { %1933 = vmatpush.xpose.msk.msra.mxu3 %vm275_vm0, %v204_v21  ;;  %v252_v21 = vld [vmem:[%s3584_s0 + $0x758] sm:$0xff] }
  0x96   :  { %1883 = vmatpush.xpose.msk.msra.mxu0 %vm275_vm0, %v155_v22  ;;  %v268_v22 = vld [vmem:[%s3584_s0 + $0x7d8] sm:$0xff] }
  0x97   :  { %1900 = vmatpush.xpose.msk.msra.mxu1 %vm275_vm0, %v171_v23  ;;  %v219_v23 = vld [vmem:[%s3584_s0 + $0x650] sm:$0xff] }
  0x98   :  { %1917 = vmatpush.xpose.msk.msra.mxu2 %vm275_vm0, %v187_v24  ;;  %v235_v24 = vld [vmem:[%s3584_s0 + $0x6d0] sm:$0xff] }
  0x99   :  { %1934 = vmatpush.xpose.msk.msra.mxu3 %vm275_vm0, %v203_v25  ;;  %v251_v25 = vld [vmem:[%s3584_s0 + $0x750] sm:$0xff] }
  0x9a   :  { %1884 = vmatpush.xpose.msk.msra.mxu0 %vm275_vm0, %v154_v26  ;;  %v267_v26 = vld [vmem:[%s3584_s0 + $0x7d0] sm:$0xff] }
  0x9b   :  { %1901 = vmatpush.xpose.msk.msra.mxu1 %vm275_vm0, %v170_v27  ;;  %v218_v27 = vld [vmem:[%s3584_s0 + $0x648] sm:$0xff] }
  0x9c   :  { %1918 = vmatpush.xpose.msk.msra.mxu2 %vm275_vm0, %v186_v28  ;;  %v234_v28 = vld [vmem:[%s3584_s0 + $0x6c8] sm:$0xff] }
  0x9d   :  { %1935 = vmatpush.xpose.msk.msra.mxu3 %vm275_vm0, %v202_v29  ;;  %v250_v29 = vld [vmem:[%s3584_s0 + $0x748] sm:$0xff] }
  0x9e   :  { %1885 = vmatpush.xpose.msk.msra.mxu0 %vm275_vm0, %v153_v30  ;;  %v266_v30 = vld [vmem:[%s3584_s0 + $0x7c8] sm:$0xff] }
  0x9f   :  { %1902 = vmatpush.xpose.msk.msra.mxu1 %vm275_vm0, %v169_v31  ;;  %v217_v31 = vld [vmem:[%s3584_s0 + $0x640] sm:$0xff] }
  0xa0   :  { %1919 = vmatpush.xpose.msk.msra.mxu2 %vm275_vm0, %v185_v32  ;;  %v233_v32 = vld [vmem:[%s3584_s0 + $0x6c0] sm:$0xff] }
  0xa1   :  { %1936 = vmatpush.xpose.msk.msra.mxu3 %vm275_vm0, %v201_v33  ;;  %v249_v33 = vld [vmem:[%s3584_s0 + $0x740] sm:$0xff] }
  0xa2   :  { %1886 = vmatpush.xpose.msk.msra.mxu0 %vm275_vm0, %v152_v34  ;;  %v265_v34 = vld [vmem:[%s3584_s0 + $0x7c0] sm:$0xff] }
  0xa3   :  { %1903 = vmatpush.xpose.msk.msra.mxu1 %vm275_vm0, %v168_v35  ;;  %v216_v35 = vld [vmem:[%s3584_s0 + $0x638] sm:$0xff] }
  0xa4   :  { %1920 = vmatpush.xpose.msk.msra.mxu2 %vm275_vm0, %v184_v36  ;;  %v232_v36 = vld [vmem:[%s3584_s0 + $0x6b8] sm:$0xff] }
  0xa5   :  { %1937 = vmatpush.xpose.msk.msra.mxu3 %vm275_vm0, %v200_v37  ;;  %v248_v37 = vld [vmem:[%s3584_s0 + $0x738] sm:$0xff] }
  0xa6   :  { %1887 = vmatpush.xpose.msk.msra.mxu0 %vm275_vm0, %v151_v38  ;;  %v264_v38 = vld [vmem:[%s3584_s0 + $0x7b8] sm:$0xff] }
  0xa7   :  { %1904 = vmatpush.xpose.msk.msra.mxu1 %vm275_vm0, %v167_v39  ;;  %v215_v39 = vld [vmem:[%s3584_s0 + $0x630] sm:$0xff] }
  0xa8   :  { %1921 = vmatpush.xpose.msk.msra.mxu2 %vm275_vm0, %v183_v40  ;;  %v231_v40 = vld [vmem:[%s3584_s0 + $0x6b0] sm:$0xff] }
  0xa9   :  { %1938 = vmatpush.xpose.msk.msra.mxu3 %vm275_vm0, %v199_v41  ;;  %v3092_v41 = vstv %s3586_s2 }
  0xaa   :  { %1888 = vmatpush.xpose.msk.msra.mxu0 %vm275_vm0, %v150_v42 }
  0xab   :  { %1905 = vmatpush.xpose.msk.msra.mxu1 %vm275_vm0, %v166_v43  ;;  %v247_v43 = vld [vmem:[%s3584_s0 + $0x730] sm:$0xff] }
  0xac   :  { %1922 = vmatpush.xpose.msk.msra.mxu2 %vm275_vm0, %v182_v44  ;;  %v263_v44 = vld [vmem:[%s3584_s0 + $0x7b0] sm:$0xff] }
  0xad   :  { %1939 = vmatpush.xpose.msk.msra.mxu3 %vm275_vm0, %v198_v45 }
  0xae   :  { %1889 = vmatpush.xpose.msk.msra.mxu0 %vm275_vm0, %v149_v46 }
  0xaf   :  { %1906 = vmatpush.xpose.msk.msra.mxu1 %vm275_vm0, %v165_v47 }
  0xb0   :  { %1923 = vmatpush.xpose.msk.msra.mxu2 %vm275_vm0, %v181_v48  ;;  %v214_v48 = vld [vmem:[%s3584_s0 + $0x628] sm:$0xff] }
  0xb1   :  { %1940 = vmatpush.xpose.msk.msra.mxu3 %vm275_vm0, %v197_v49  ;;  %v230_v49 = vld [vmem:[%s3584_s0 + $0x6a8] sm:$0xff] }
  0xb2   :  { %1890 = vmatpush.xpose.msk.msra.mxu0 %vm275_vm0, %v148_v50 }
  0xb3   :  { %1907 = vmatpush.xpose.msk.msra.mxu1 %vm275_vm0, %v164_v51  ;;  %v246_v51 = vld [vmem:[%s3584_s0 + $0x728] sm:$0xff] }
  0xb4   :  { %1924 = vmatpush.xpose.msk.msra.mxu2 %vm275_vm0, %v180_v52  ;;  %v262_v52 = vld [vmem:[%s3584_s0 + $0x7a8] sm:$0xff] }
  0xb5   :  { %1941 = vmatpush.xpose.msk.msra.mxu3 %vm275_vm0, %v196_v53 }
  0xb6   :  { %1891 = vmatpush.xpose.msk.msra.mxu0 %vm275_vm0, %v147_v54 }
  0xb7   :  { %1908 = vmatpush.xpose.msk.msra.mxu1 %vm275_vm0, %v163_v55 }
  0xb8   :  { %1925 = vmatpush.xpose.msk.msra.mxu2 %vm275_vm0, %v179_v56 }
  0xb9   :  { %1942 = vmatpush.xpose.msk.msra.mxu3 %vm275_vm0, %v195_v57  ;;  %v213_v57 = vld [vmem:[%s3584_s0 + $0x620] sm:$0xff] }
  0xba   :  { %1892 = vmatpush.xpose.msk.msra.mxu0 %vm275_vm0, %v146_v58  ;;  %v229_v58 = vld [vmem:[%s3584_s0 + $0x6a0] sm:$0xff] }
  0xbb   :  { %1909 = vmatpush.xpose.msk.msra.mxu1 %vm275_vm0, %v162_v59  ;;  %v245_v59 = vld [vmem:[%s3584_s0 + $0x720] sm:$0xff] }
  0xbc   :  { %1926 = vmatpush.xpose.msk.msra.mxu2 %vm275_vm0, %v178_v60  ;;  %v261_v60 = vld [vmem:[%s3584_s0 + $0x7a0] sm:$0xff] }
  0xbd   :  { %1943 = vmatpush.xpose.msk.msra.mxu3 %vm275_vm0, %v194_v61 }
  0xbe   :  { %1893 = vmatpush.xpose.msk.msra.mxu0 %vm275_vm0, %v145_v62  ;;  %v1064_v50 = vpop.f32.mrf.mxu0 }
  0xbf   :  { %1910 = vmatpush.xpose.msk.msra.mxu1 %vm275_vm0, %v161_v63  ;;  %v1084_v42 = vpop.f32.mrf.mxu1  ;;  %v1065_v56 = vadd.f32 %v1064_v50, %v3092_v41 }
  0xc0   :  { %1927 = vmatpush.xpose.msk.msra.mxu2 %vm275_vm0, %v177_v0  ;;  %v1085_v46 = vadd.f32 %v1084_v42, %v3092_v41  ;;  %v212_v0 = vld [vmem:[%s3584_s0 + $0x618] sm:$0xff] }
  0xc1   :  { %1944 = vmatpush.xpose.msk.msra.mxu3 %vm275_vm0, %v193_v1  ;;  %1894 = vmatmul.msk.f32.vlgmr.msra.gmra.mxu0 %vm275_vm0, %v2471_v18  ;;  %v2014_v63 = vmul.f32 -1.442695, %v1065_v56  ;;  %v228_v1 = vld [vmem:[%s3584_s0 + $0x698] sm:$0xff] }
  0xc2   :  { %1946 = vmatpush.xpose.msk.msrb.mxu0 %vm275_vm0, %v224_v2  ;;  %1911 = vmatmul.msk.f32.vlgmr.msra.gmra.mxu1 %vm275_vm0, %v2471_v18  ;;  %v2015_v55 = vmul.f32 -1.442695, %v1085_v46  ;;  %v244_v2 = vld [vmem:[%s3584_s0 + $0x718] sm:$0xff] }
  0xc3   :  { %1963 = vmatpush.xpose.msk.msrb.mxu1 %vm275_vm0, %v240_v3  ;;  %1928 = vmatmul.msk.f32.vlgmr.msra.gmra.mxu2 %vm275_vm0, %v2471_v18  ;;  %v260_v3 = vld [vmem:[%s3584_s0 + $0x798] sm:$0xff] }
  0xc4   :  { %1980 = vmatpush.xpose.msk.msrb.mxu2 %vm275_vm0, %v256_v4  ;;  %1945 = vmatmul.msk.f32.vlgmr.msra.gmra.mxu3 %vm275_vm0, %v2471_v18  ;;  %2031 = vpow2.f32 %v2015_v55  ;;  %v211_v4 = vld [vmem:[%s3584_s0 + $0x610] sm:$0xff] }
  0xc5   :  { %1997 = vmatpush.xpose.msk.msrb.mxu3 %vm275_vm0, %v272_v5  ;;  %v227_v5 = vld [vmem:[%s3584_s0 + $0x690] sm:$0xff] }
  0xc6   :  { %1947 = vmatpush.xpose.msk.msrb.mxu0 %vm275_vm0, %v223_v6  ;;  %v1104_v45 = vpop.f32.mrf.mxu2 }
  0xc7   :  { %1964 = vmatpush.xpose.msk.msrb.mxu1 %vm275_vm0, %v239_v7  ;;  %v1124_v47 = vpop.f32.mrf.mxu3  ;;  %v1105_v53 = vadd.f32 %v1104_v45, %v3092_v41  ;;  %v243_v7 = vld [vmem:[%s3584_s0 + $0x710] sm:$0xff] }
  0xc8   :  { %1981 = vmatpush.xpose.msk.msrb.mxu2 %vm275_vm0, %v255_v8  ;;  %v1125_v54 = vadd.f32 %v1124_v47, %v3092_v41  ;;  %v259_v8 = vld [vmem:[%s3584_s0 + $0x790] sm:$0xff] }
  0xc9   :  { %1998 = vmatpush.xpose.msk.msrb.mxu3 %vm275_vm0, %v271_v9  ;;  %v2016_v61 = vmul.f32 -1.442695, %v1105_v53 }
  0xca   :  { %1948 = vmatpush.xpose.msk.msrb.mxu0 %vm275_vm0, %v222_v10  ;;  %v2017_v62 = vmul.f32 -1.442695, %v1125_v54  ;;  %v2032_v6 = vpop.eup %2031 }
  0xcb   :  { %1965 = vmatpush.xpose.msk.msrb.mxu1 %vm275_vm0, %v238_v11  ;;  %2033 = vpow2.f32 %v2016_v61  ;;  %v3172_v11 = vadd.f32 1.0, %v2032_v6 }
  0xcc   :  { %1982 = vmatpush.xpose.msk.msrb.mxu2 %vm275_vm0, %v254_v12  ;;  %2035 = vpow2.f32 %v2017_v62  ;;  %v210_v12 = vld [vmem:[%s3584_s0 + $0x608] sm:$0xff] }
  0xcd   :  { %1999 = vmatpush.xpose.msk.msrb.mxu3 %vm275_vm0, %v270_v13  ;;  %2037 = vpow2.f32 %v2014_v63  ;;  %v226_v13 = vld [vmem:[%s3584_s0 + $0x688] sm:$0xff]  ;;  %vm1451_vm1 = vweird.f32 %v3172_v11  ;;  %v1455_v50 = vand.u32 2147483647, %v3172_v11 }
  0xce   :  { %1949 = vmatpush.xpose.msk.msrb.mxu0 %vm275_vm0, %v221_v14  ;;  %2039 = vrcp.f32 %v3172_v11 }
  0xcf   :  { %1966 = vmatpush.xpose.msk.msrb.mxu1 %vm275_vm0, %v237_v15  ;;  %v242_v15 = vld [vmem:[%s3584_s0 + $0x708] sm:$0xff]  ;;  %vm1456_vm11 = vcmp.eq.f32.partialorder %v1455_v50, 8.507059e+37 }
  0xd0   :  { %1983 = vmatpush.xpose.msk.msrb.mxu2 %vm275_vm0, %v253_v16  ;;  %v258_v16 = vld [vmem:[%s3584_s0 + $0x788] sm:$0xff] }
  0xd1   :  { %2000 = vmatpush.xpose.msk.msrb.mxu3 %vm275_vm0, %v269_v17  ;;  %v2034_v9 = vpop.eup %2033 }
  0xd2   :  { %1950 = vmatpush.xpose.msk.msrb.mxu0 %vm275_vm0, %v220_v19  ;;  %v2036_v10 = vpop.eup %2035  ;;  %v3186_v17 = vadd.f32 1.0, %v2034_v9 }
  0xd3   :  { %1967 = vmatpush.xpose.msk.msrb.mxu1 %vm275_vm0, %v236_v20  ;;  %v2038_v14 = vpop.eup %2037  ;;  %v3188_v19 = vadd.f32 1.0, %v2036_v10 }
  0xd4   :  { %1984 = vmatpush.xpose.msk.msrb.mxu2 %vm275_vm0, %v252_v21  ;;  %v3195_v20 = vadd.f32 1.0, %v2038_v14  ;;  %v209_v21 = vld [vmem:[%s3584_s0 + $0x600] sm:$0xff]  ;;  %2041 = vrcp.f32 %v3186_v17  ;;  %vm1466_vm2 = vweird.f32 %v3186_v17  ;;  %v1472_v53 = vand.u32 2147483648, %v3186_v17 }
  0xd5   :  { %2001 = vmatpush.xpose.msk.msrb.mxu3 %vm275_vm0, %v268_v22  ;;  %v225_v22 = vld [vmem:[%s3584_s0 + $0x680] sm:$0xff]  ;;  %2043 = vrcp.f32 %v3188_v19  ;;  %vm1481_vm4 = vweird.f32 %v3188_v19  ;;  %v1485_v62 = vand.u32 2147483647, %v3188_v19  ;;  %v1487_v63 = vand.u32 2147483648, %v3188_v19 }
  0xd6   :  { %1951 = vmatpush.xpose.msk.msrb.mxu0 %vm275_vm0, %v219_v23  ;;  %v241_v23 = vld [vmem:[%s3584_s0 + $0x700] sm:$0xff]  ;;  %2045 = vrcp.f32 %v3195_v20  ;;  %vm1436_vm8 = vweird.f32 %v3195_v20  ;;  %v1440_v9 = vand.u32 2147483647, %v3195_v20 }
  0xd7   :  { %1968 = vmatpush.xpose.msk.msrb.mxu1 %vm275_vm0, %v235_v24  ;;  %v257_v24 = vld [vmem:[%s3584_s0 + $0x780] sm:$0xff]  ;;  %vm3308_vm15 = vcmp.eq.f32.partialorder %v1485_v62, 8.507059e+37  ;;  %s2121_s0 = smov [#allocation3]  }
  0xd8   :  { %1985 = vmatpush.xpose.msk.msrb.mxu2 %vm275_vm0, %v251_v25  ;;  %v3216_v25 = vpop.eup %2039  ;;  %s1731_s27 = sshll.u32 %s2121_s0, 4  ;;  %s1732_s27 = int_to_ptr.vmem [resolvable:$true] %s1731_s27 }
  0xd9   :  { %2002 = vmatpush.xpose.msk.msrb.mxu3 %vm275_vm0, %v267_v26  ;;  %vm1452_vm3 = vweird.f32 %v3216_v25 }
  0xda   :  { %1952 = vmatpush.xpose.msk.msrb.mxu0 %vm275_vm0, %v218_v27  ;;  %v3226_v26 = vpop.eup %2041  ;;  %vm3260_vm6 = vmor %vm1451_vm1, %vm1452_vm3 }
  0xdb   :  { %1969 = vmatpush.xpose.msk.msrb.mxu1 %vm275_vm0, %v234_v28  ;;  %v3228_v27 = vpop.eup %2043  ;;  %v1447_v28 = vmul.f32 %v3216_v25, %v3172_v11  ;;  %vm1467_vm5 = vweird.f32 %v3226_v26 }
  0xdc   :  { %1986 = vmatpush.xpose.msk.msrb.mxu2 %vm275_vm0, %v250_v29  ;;  %vm1482_vm7 = vweird.f32 %v3228_v27  ;;  %vm3275_vm10 = vmor %vm1466_vm2, %vm1467_vm5 }
  0xdd   :  { %2003 = vmatpush.xpose.msk.msrb.mxu3 %vm275_vm0, %v266_v30  ;;  %vm3285_vm12 = vmor %vm1481_vm4, %vm1482_vm7 }
  0xde   :  { %1953 = vmatpush.xpose.msk.msrb.mxu0 %vm275_vm0, %v217_v31  ;;  %v3232_v31 = vpop.eup %2045 }
  0xdf   :  { %1970 = vmatpush.xpose.msk.msrb.mxu1 %vm275_vm0, %v233_v32  ;;  %vm1437_vm9 = vweird.f32 %v3232_v31 }
  0xe0   :  { %1987 = vmatpush.xpose.msk.msrb.mxu2 %vm275_vm0, %v249_v33  ;;  %vm3302_vm14 = vmor %vm1436_vm8, %vm1437_vm9 }
  0xe1   :  { %2004 = vmatpush.xpose.msk.msrb.mxu3 %vm275_vm0, %v265_v34  ;;  %v1462_v34 = vmul.f32 %v3226_v26, %v3186_v17 }
  0xe2   :  { %1954 = vmatpush.xpose.msk.msrb.mxu0 %vm275_vm0, %v216_v35 }
  0xe3   :  { %1971 = vmatpush.xpose.msk.msrb.mxu1 %vm275_vm0, %v232_v36 }
  0xe4   :  { %1988 = vmatpush.xpose.msk.msrb.mxu2 %vm275_vm0, %v248_v37  ;;  %v1448_v37 = vsub.f32 1.0, %v1447_v28 }
  0xe5   :  { %2005 = vmatpush.xpose.msk.msrb.mxu3 %vm275_vm0, %v264_v38  ;;  %v1432_v38 = vmul.f32 %v3232_v31, %v3195_v20 }
  0xe6   :  { %1955 = vmatpush.xpose.msk.msrb.mxu0 %vm275_vm0, %v215_v39  ;;  %v1449_v46 = vmul.f32 %v3216_v25, %v1448_v37 }
  0xe7   :  { %1972 = vmatpush.xpose.msk.msrb.mxu1 %vm275_vm0, %v231_v40  ;;  %v1433_v47 = vsub.f32 1.0, %v1432_v38 }
  0xe8   :  { %1989 = vmatpush.xpose.msk.msrb.mxu2 %vm275_vm0, %v247_v43 }
  0xe9   :  { %2006 = vmatpush.xpose.msk.msrb.mxu3 %vm275_vm0, %v263_v44  ;;  %v1463_v44 = vsub.f32 1.0, %v1462_v34 }
  0xea   :  { %1956 = vmatpush.xpose.msk.msrb.mxu0 %vm275_vm0, %v214_v48 }
  0xeb   :  { %1973 = vmatpush.xpose.msk.msrb.mxu1 %vm275_vm0, %v230_v49  ;;  %v1464_v55 = vmul.f32 %v3226_v26, %v1463_v44 }
  0xec   :  { %1990 = vmatpush.xpose.msk.msrb.mxu2 %vm275_vm0, %v246_v51  ;;  %v1457_v51 = vand.u32 2147483648, %v3172_v11 }
  0xed   :  { %2007 = vmatpush.xpose.msk.msrb.mxu3 %vm275_vm0, %v262_v52  ;;  %v1470_v52 = vand.u32 2147483647, %v3186_v17  ;;  %v1488_v17 = vor.u32 1.1754944e-38, %v1487_v63 }
  0xee   :  { %1957 = vmatpush.xpose.msk.msrb.mxu0 %vm275_vm0, %v213_v57 }
  0xef   :  { %1974 = vmatpush.xpose.msk.msrb.mxu1 %vm275_vm0, %v229_v58  ;;  %v1450_v58 = vadd.f32 %v3216_v25, %v1449_v46  ;;  %vm3294_vm13 = vcmp.eq.f32.partialorder %v1470_v52, 8.507059e+37 }
  0xf0   :  { %1991 = vmatpush.xpose.msk.msrb.mxu2 %vm275_vm0, %v245_v59  ;;  %v1434_v59 = vmul.f32 %v3232_v31, %v1433_v47 }
  0xf1   :  { %2008 = vmatpush.xpose.msk.msrb.mxu3 %vm275_vm0, %v261_v60  ;;  %v1454_v10 = vsel %vm3260_vm6, %v3216_v25, %v1450_v58 }
  0xf2   :  { %1958 = vmatpush.xpose.msk.msrb.mxu0 %vm275_vm0, %v212_v0 }
  0xf3   :  { %1975 = vmatpush.xpose.msk.msrb.mxu1 %vm275_vm0, %v228_v1  ;;  %v1442_v1 = vand.u32 2147483648, %v3195_v20 }
  0xf4   :  { %1992 = vmatpush.xpose.msk.msrb.mxu2 %vm275_vm0, %v244_v2  ;;  %v1458_v2 = vor.u32 1.1754944e-38, %v1457_v51 }
  0xf5   :  { %2009 = vmatpush.xpose.msk.msrb.mxu3 %vm275_vm0, %v260_v3  ;;  %v1465_v3 = vadd.f32 %v3226_v26, %v1464_v55 }
  0xf6   :  { %1959 = vmatpush.xpose.msk.msrb.mxu0 %vm275_vm0, %v211_v4 }
  0xf7   :  { %1976 = vmatpush.xpose.msk.msrb.mxu1 %vm275_vm0, %v227_v5  ;;  %v1469_v20 = vsel %vm3275_vm10, %v3226_v26, %v1465_v3 }
  0xf8   :  { %1993 = vmatpush.xpose.msk.msrb.mxu2 %vm275_vm0, %v243_v7 }
  0xf9   :  { %2010 = vmatpush.xpose.msk.msrb.mxu3 %vm275_vm0, %v259_v8  ;;  %v1435_v8 = vadd.f32 %v3232_v31, %v1434_v59 }
  0xfa   :  { %1960 = vmatpush.xpose.msk.msrb.mxu0 %vm275_vm0, %v210_v12 }
  0xfb   :  { %1977 = vmatpush.xpose.msk.msrb.mxu1 %vm275_vm0, %v226_v13  ;;  %v1473_v13 = vor.u32 1.1754944e-38, %v1472_v53  ;;  %v1439_v28 = vsel %vm3302_vm14, %v3232_v31, %v1435_v8 }
  0xfc   :  { %1994 = vmatpush.xpose.msk.msrb.mxu2 %vm275_vm0, %v242_v15 }
  0xfd   :  { %2011 = vmatpush.xpose.msk.msrb.mxu3 %vm275_vm0, %v258_v16 }
  0xfe   :  { %1961 = vmatpush.xpose.msk.msrb.mxu0 %vm275_vm0, %v209_v21  ;;  %v1144_v29 = vpop.f32.mrf.mxu0 }
  0xff   :  { %1978 = vmatpush.xpose.msk.msrb.mxu1 %vm275_vm0, %v225_v22  ;;  %v1164_v30 = vpop.f32.mrf.mxu1  ;;  %v1145_v32 = vadd.f32 %v1144_v29, %v3092_v41  ;;  %v3315_v22 = vsel %vm1456_vm11, %v1458_v2, %v1454_v10 }
 0x100   :  { %1995 = vmatpush.xpose.msk.msrb.mxu2 %vm275_vm0, %v241_v23  ;;  %v1165_v33 = vadd.f32 %v1164_v30, %v3092_v41  ;;  %v1687_v31 = vrot.slane %v3315_v22, 7 }
 0x101   :  { %2012 = vmatpush.xpose.msk.msrb.mxu3 %vm275_vm0, %v257_v24  ;;  %1962 = vmatmul.msk.f32.vlgmr.msrb.gmra.mxu0 %vm275_vm0, %v2471_v18  ;;  %v2018_v35 = vmul.f32 -1.442695, %v1145_v32 }
 0x102   :  { %1979 = vmatmul.msk.f32.vlgmr.msrb.gmra.mxu1 %vm275_vm0, %v2471_v18  ;;  %v2019_v36 = vmul.f32 -1.442695, %v1165_v33 }
 0x103   :  { %1996 = vmatmul.msk.f32.vlgmr.msrb.gmra.mxu2 %vm275_vm0, %v2471_v18  ;;  %2047 = vpow2.f32 %v2018_v35 }
 0x104   :  { %2013 = vmatmul.msk.f32.vlgmr.msrb.gmra.mxu3 %vm275_vm0, %v2471_v18  ;;  %v1477_v18 = vmul.f32 %v3228_v27, %v3188_v19  ;;  %2049 = vpow2.f32 %v2019_v36  ;;  %v1443_v19 = vor.u32 1.1754944e-38, %v1442_v1  ;;  %vm1441_vm0 = vcmp.eq.f32.partialorder %v1440_v9, 8.507059e+37 }
 0x106   :  { %v1184_v39 = vpop.f32.mrf.mxu2  ;;  %v1478_v45 = vsub.f32 1.0, %v1477_v18  ;;  %v1444_v36 = vsel %vm1441_vm0, %v1443_v19, %v1439_v28  ;;  %vm1701_vm0 = vcmask 1040384  }
 0x107   :  { %v1204_v40 = vpop.f32.mrf.mxu3  ;;  %v1185_v42 = vadd.f32 %v1184_v39, %v3092_v41 }
 0x108   :  { %v1205_v43 = vadd.f32 %v1204_v40, %v3092_v41  ;;  %v1479_v56 = vmul.f32 %v3228_v27, %v1478_v45 }
 0x109   :  { %v2020_v48 = vmul.f32 -1.442695, %v1185_v42  ;;  %v2048_v54 = vpop.eup %2047 }
 0x10a   :  { %v2021_v49 = vmul.f32 -1.442695, %v1205_v43  ;;  %v2050_v57 = vpop.eup %2049  ;;  %v1419_v60 = vadd.f32 1.0, %v2048_v54  ;;  %v1480_v5 = vadd.f32 %v3228_v27, %v1479_v56 }
 0x10b   :  { %2051 = vpow2.f32 %v2020_v48  ;;  %v3267_v0 = vadd.f32 1.0, %v2050_v57 }
 0x10c   :  { %2053 = vpow2.f32 %v2021_v49  ;;  %v1484_v23 = vsel %vm3285_vm12, %v3228_v27, %v1480_v5  ;;  %v1500_v25 = vand.u32 2147483647, %v1419_v60  ;;  %v1502_v32 = vand.u32 2147483648, %v1419_v60 }
 0x10d   :  { %2055 = vrcp.f32 %v1419_v60  ;;  %v1515_v33 = vand.u32 2147483647, %v3267_v0  ;;  %v1517_v26 = vand.u32 2147483648, %v3267_v0  ;;  %v3332_v27 = vsel %vm3294_vm13, %v1473_v13, %v1469_v20 }
 0x10e   :  { %2057 = vrcp.f32 %v3267_v0  ;;  %v3336_v18 = vsel %vm3308_vm15, %v1488_v17, %v1484_v23  ;;  %vm1496_vm1 = vweird.f32 %v1419_v60  ;;  %vm3339_vm3 = vcmp.eq.f32.partialorder %v1500_v25, 8.507059e+37 }
 0x10f   :  { %vm1511_vm4 = vweird.f32 %v3267_v0  ;;  %v1503_v42 = vor.u32 1.1754944e-38, %v1502_v32  ;;  %vm3344_vm6 = vcmp.eq.f32.partialorder %v1515_v33, 8.507059e+37  ;;  %v1518_v44 = vor.u32 1.1754944e-38, %v1517_v26 }
 0x110   :  { %v1688_v63 = vrot.slane %v3332_v27, 6  ;;  %v1689_v4 = vrot.slane %v3336_v18, 5  ;;  %v1702_v13 = vsel %vm1701_vm0, %v1444_v36, %v1687_v31 }
 0x111   :  { %v2052_v6 = vpop.eup %2051 }
 0x112   :  { %v2054_v11 = vpop.eup %2053  ;;  %v3306_v15 = vadd.f32 1.0, %v2052_v6 }
 0x113   :  { %v3312_v21 = vadd.f32 1.0, %v2054_v11  ;;  %v2056_v24 = vpop.eup %2055 }
 0x114   :  { %2059 = vrcp.f32 %v3306_v15  ;;  %v2058_v29 = vpop.eup %2057  ;;  %v1492_v30 = vmul.f32 %v2056_v24, %v1419_v60  ;;  %vm1497_vm2 = vweird.f32 %v2056_v24  ;;  %vm1526_vm8 = vweird.f32 %v3306_v15 }
 0x115   :  { %2061 = vrcp.f32 %v3312_v21  ;;  %v1507_v34 = vmul.f32 %v2058_v29, %v3267_v0  ;;  %vm1512_vm5 = vweird.f32 %v2058_v29  ;;  %vm3348_vm7 = vmor %vm1496_vm1, %vm1497_vm2  ;;  %v1530_v49 = vand.u32 2147483647, %v3306_v15 }
 0x116   :  { %v1493_v35 = vsub.f32 1.0, %v1492_v30  ;;  %vm3355_vm9 = vmor %vm1511_vm4, %vm1512_vm5  ;;  %v1532_v52 = vand.u32 2147483648, %v3306_v15  ;;  %vm1541_vm10 = vweird.f32 %v3312_v21  ;;  %v1547_v56 = vand.u32 2147483648, %v3312_v21 }
 0x117   :  { %v1508_v38 = vsub.f32 1.0, %v1507_v34  ;;  %v1545_v58 = vand.u32 2147483647, %v3312_v21  ;;  %vm1531_vm14 = vcmp.eq.f32.partialorder %v1530_v49, 8.507059e+37  ;;  %vm1703_vm2 = vcmask 1042434  }
 0x118   :  { %v1494_v40 = vmul.f32 %v2056_v24, %v1493_v35  ;;  %v1533_v1 = vor.u32 1.1754944e-38, %v1532_v52  ;;  %v1548_v6 = vor.u32 1.1754944e-38, %v1547_v56  ;;  %vm1705_vm4 = vcmask 1041408  }
 0x119   :  { %v1509_v47 = vmul.f32 %v2058_v29, %v1508_v38  ;;  %vm1546_vm1 = vcmp.eq.f32.partialorder %v1545_v58, 8.507059e+37  ;;  %vm1709_vm5 = vcmask 1046534   ;;  %v1704_v17 = vsel %vm1703_vm2, %v1688_v63, %v1689_v4 }
 0x11a   :  { %v2060_v39 = vpop.eup %2059  ;;  %v1495_v50 = vadd.f32 %v2056_v24, %v1494_v40  ;;  %v1706_v22 = vsel %vm1705_vm4, %v1702_v13, %v1704_v17 }
 0x11b   :  { %v2062_v45 = vpop.eup %2061  ;;  %v1522_v48 = vmul.f32 %v2060_v39, %v3306_v15  ;;  %v1510_v54 = vadd.f32 %v2058_v29, %v1509_v47  ;;  %vm1527_vm11 = vweird.f32 %v2060_v39 }
 0x11c   :  { %v1537_v53 = vmul.f32 %v2062_v45, %v3312_v21  ;;  %vm1542_vm12 = vweird.f32 %v2062_v45  ;;  %v1499_v59 = vsel %vm3348_vm7, %v2056_v24, %v1495_v50  ;;  %vm3373_vm13 = vmor %vm1526_vm8, %vm1527_vm11  ;;  %vm3588_vm7 = vcmask 1043456  }
 0x11d   :  { %v1523_v55 = vsub.f32 1.0, %v1522_v48  ;;  %v1504_v61 = vsel %vm3339_vm3, %v1503_v42, %v1499_v59  ;;  %v1514_v62 = vsel %vm3355_vm9, %v2058_v29, %v1510_v54  ;;  %vm1543_vm15 = vmor %vm1541_vm10, %vm1542_vm12  ;;  %vm1707_vm3 = vcmask 1044484  }
 0x11e   :  { %v1538_v57 = vsub.f32 1.0, %v1537_v53  ;;  %v1519_v3 = vsel %vm3344_vm6, %v1518_v44, %v1514_v62  ;;  %v1690_v8 = vrot.slane %v1504_v61, 4  ;;  %vm3589_vm6 = vcmask 1045508  }
 0x11f   :  { %v1524_v60 = vmul.f32 %v2060_v39, %v1523_v55  ;;  %v1691_v9 = vrot.slane %v1519_v3, 3 }
 0x120   :  { %v1539_v2 = vmul.f32 %v2062_v45, %v1538_v57 }
 0x121   :  { %v1525_v5 = vadd.f32 %v2060_v39, %v1524_v60  ;;  %v1708_v19 = vsel %vm1707_vm3, %v1690_v8, %v1691_v9 }
 0x122   :  { %v1540_v7 = vadd.f32 %v2062_v45, %v1539_v2 }
 0x123   :  { %v1529_v10 = vsel %vm3373_vm13, %v2060_v39, %v1525_v5 }
 0x124   :  { %v1534_v11 = vsel %vm1531_vm14, %v1533_v1, %v1529_v10  ;;  %v1544_v12 = vsel %vm1543_vm15, %v2062_v45, %v1540_v7 }
 0x125   :  { %v1549_v14 = vsel %vm1546_vm1, %v1548_v6, %v1544_v12  ;;  %v1692_v15 = vrot.slane %v1534_v11, 2 }
 0x126   :  { %v1693_v16 = vrot.slane %v1549_v14, 1 }
 0x128   :  { %v1710_v21 = vsel %vm1709_vm5, %v1692_v15, %v1693_v16 }
 0x129   :  { %v1712_v20 = vsel %vm3589_vm6, %v1708_v19, %v1710_v21 }
 0x12a   :  { %v1714_v23 = vsel %vm3588_vm7, %v1706_v22, %v1712_v20 }
 0x12b   :  { %1724 = vst [vmem:[#allocation3] sm:$0xff] %v1714_v23 }
 0x13e   :  { %v1224_v29 = vpop.f32.mrf.mxu0 }
 0x13f   :  { %v1244_v24 = vpop.f32.mrf.mxu1  ;;  %v1225_v33 = vadd.f32 %v1224_v29, %v3092_v41 }
 0x140   :  { %v1245_v28 = vadd.f32 %v1244_v24, %v3092_v41 }
 0x141   :  { %v2022_v18 = vmul.f32 -1.442695, %v1225_v33 }
 0x142   :  { %v2023_v26 = vmul.f32 -1.442695, %v1245_v28 }
 0x144   :  { %2063 = vpow2.f32 %v2023_v26 }
 0x146   :  { %v1264_v25 = vpop.f32.mrf.mxu2 }
 0x147   :  { %v1265_v30 = vadd.f32 %v1264_v25, %v3092_v41  ;;  %v1284_v32 = vpop.f32.mrf.mxu3 }
 0x148   :  { %v1285_v34 = vadd.f32 %v1284_v32, %v3092_v41 }
 0x149   :  { %v2024_v27 = vmul.f32 -1.442695, %v1265_v30 }
 0x14a   :  { %v2025_v31 = vmul.f32 -1.442695, %v1285_v34  ;;  %v2064_v35 = vpop.eup %2063 }
 0x14b   :  { %2065 = vpow2.f32 %v2024_v27  ;;  %v1424_v38 = vadd.f32 1.0, %v2064_v35 }
 0x14c   :  { %2067 = vpow2.f32 %v2022_v18 }
 0x14d   :  { %2069 = vpow2.f32 %v2025_v31  ;;  %v1575_v4 = vand.u32 2147483647, %v1424_v38  ;;  %v1577_v9 = vand.u32 2147483648, %v1424_v38  ;;  %vm1571_vm8 = vweird.f32 %v1424_v38 }
 0x14e   :  { %2071 = vrcp.f32 %v1424_v38 }
 0x14f   :  { %vm3437_vm13 = vcmp.eq.f32.partialorder %v1575_v4, 8.507059e+37  ;;  %v1578_v22 = vor.u32 1.1754944e-38, %v1577_v9 }
 0x151   :  { %v2066_v36 = vpop.eup %2065 }
 0x152   :  { %v2068_v37 = vpop.eup %2067  ;;  %v3395_v40 = vadd.f32 1.0, %v2066_v36 }
 0x153   :  { %v2070_v39 = vpop.eup %2069  ;;  %v3397_v42 = vadd.f32 1.0, %v2068_v37 }
 0x154   :  { %v3399_v43 = vadd.f32 1.0, %v2070_v39  ;;  %2073 = vrcp.f32 %v3395_v40  ;;  %v3406_v48 = vpop.eup %2071  ;;  %vm1586_vm11 = vweird.f32 %v3395_v40  ;;  %v1590_v11 = vand.u32 2147483647, %v3395_v40 }
 0x155   :  { %2075 = vrcp.f32 %v3397_v42  ;;  %v1567_v54 = vmul.f32 %v3406_v48, %v1424_v38  ;;  %vm1572_vm9 = vweird.f32 %v3406_v48  ;;  %vm1556_vm10 = vweird.f32 %v3397_v42 }
 0x156   :  { %2077 = vrcp.f32 %v3399_v43  ;;  %v1592_v12 = vand.u32 2147483648, %v3395_v40  ;;  %v1562_v16 = vand.u32 2147483648, %v3397_v42  ;;  %vm3445_vm14 = vmor %vm1571_vm8, %vm1572_vm9  ;;  %vm1601_vm15 = vweird.f32 %v3399_v43 }
 0x157   :  { %v1568_v62 = vsub.f32 1.0, %v1567_v54  ;;  %v1605_v25 = vand.u32 2147483647, %v3399_v43  ;;  %v1607_v28 = vand.u32 2147483648, %v3399_v43  ;;  %vm3464_vm8 = vcmp.eq.f32.partialorder %v1590_v11, 8.507059e+37 }
 0x158   :  { %v1593_v33 = vor.u32 1.1754944e-38, %v1592_v12  ;;  %v1560_v37 = vand.u32 2147483647, %v3397_v42 }
 0x15a   :  { %v3408_v49 = vpop.eup %2073 }
 0x15b   :  { %v3410_v52 = vpop.eup %2075  ;;  %v1582_v55 = vmul.f32 %v3408_v49, %v3395_v40  ;;  %vm1587_vm12 = vweird.f32 %v3408_v49 }
 0x15c   :  { %v3412_v53 = vpop.eup %2077  ;;  %v1552_v61 = vmul.f32 %v3410_v52, %v3397_v42  ;;  %vm3453_vm1 = vmor %vm1586_vm11, %vm1587_vm12  ;;  %vm1557_vm9 = vweird.f32 %v3410_v52 }
 0x15d   :  { %v1597_v60 = vmul.f32 %v3412_v53, %v3399_v43  ;;  %v1583_v63 = vsub.f32 1.0, %v1582_v55  ;;  %vm1602_vm7 = vweird.f32 %v3412_v53  ;;  %vm3497_vm12 = vmor %vm1556_vm10, %vm1557_vm9  ;;  %vm3524_vm10 = vcmp.eq.f32.partialorder %v1560_v37, 8.507059e+37 }
 0x15e   :  { %v1553_v7 = vsub.f32 1.0, %v1552_v61  ;;  %vm3482_vm11 = vmor %vm1601_vm15, %vm1602_vm7  ;;  %vm3502_vm7 = vcmp.eq.f32.partialorder %v1605_v25, 8.507059e+37 }
 0x15f   :  { %v1598_v6 = vsub.f32 1.0, %v1597_v60  ;;  %v1584_v10 = vmul.f32 %v3408_v49, %v1583_v63 }
 0x160   :  { %v1554_v15 = vmul.f32 %v3410_v52, %v1553_v7 }
 0x161   :  { %v1599_v14 = vmul.f32 %v3412_v53, %v1598_v6  ;;  %v1585_v20 = vadd.f32 %v3408_v49, %v1584_v10 }
 0x162   :  { %v3478_v31 = vadd.f32 %v3410_v52, %v1554_v15 }
 0x163   :  { %v1600_v27 = vadd.f32 %v3412_v53, %v1599_v14  ;;  %v1589_v39 = vsel %vm3453_vm1, %v3408_v49, %v1585_v20 }
 0x164   :  { %v3513_v42 = vsel %vm3464_vm8, %v1593_v33, %v1589_v39  ;;  %v1559_v55 = vsel %vm3497_vm12, %v3410_v52, %v3478_v31 }
 0x17e   :  { %v1304_v44 = vpop.f32.mrf.mxu0 }
 0x17f   :  { %v1324_v45 = vpop.f32.mrf.mxu1  ;;  %v1305_v46 = vadd.f32 %v1304_v44, %v3092_v41 }
 0x180   :  { %v1325_v47 = vadd.f32 %v1324_v45, %v3092_v41  ;;  %v1608_v45 = vor.u32 1.1754944e-38, %v1607_v28 }
 0x181   :  { %v2026_v50 = vmul.f32 -1.442695, %v1305_v46  ;;  %v1563_v46 = vor.u32 1.1754944e-38, %v1562_v16 }
 0x182   :  { %v2027_v51 = vmul.f32 -1.442695, %v1325_v47 }
 0x183   :  { %2079 = vpow2.f32 %v2026_v50  ;;  %v1604_v50 = vsel %vm3482_vm11, %v3412_v53, %v1600_v27  ;;  %v1564_v28 = vsel %vm3524_vm10, %v1563_v46, %v1559_v55  ;;  %vm3634_vm10 = vcmask 1045508  }
 0x184   :  { %2081 = vpow2.f32 %v2027_v51  ;;  %v1609_v63 = vsel %vm3502_vm7, %v1608_v45, %v1604_v50 }
 0x185   :  { %v1696_v20 = vrot.slane %v1609_v63, 5 }
 0x186   :  { %v1344_v56 = vpop.f32.mrf.mxu2 }
 0x187   :  { %v1364_v57 = vpop.f32.mrf.mxu3  ;;  %v1345_v58 = vadd.f32 %v1344_v56, %v3092_v41 }
 0x188   :  { %v1365_v59 = vadd.f32 %v1364_v57, %v3092_v41  ;;  %v1569_v41 = vmul.f32 %v3406_v48, %v1568_v62 }
 0x189   :  { %v2028_v0 = vmul.f32 -1.442695, %v1345_v58  ;;  %v2080_v2 = vpop.eup %2079 }
 0x18a   :  { %v2029_v1 = vmul.f32 -1.442695, %v1365_v59  ;;  %v2082_v3 = vpop.eup %2081  ;;  %v3423_v5 = vadd.f32 1.0, %v2080_v2  ;;  %v1570_v19 = vadd.f32 %v3406_v48, %v1569_v41 }
 0x18b   :  { %2083 = vpow2.f32 %v2028_v0  ;;  %v3425_v8 = vadd.f32 1.0, %v2082_v3 }
 0x18c   :  { %2085 = vpow2.f32 %v2029_v1  ;;  %v1574_v38 = vsel %vm3445_vm14, %v3406_v48, %v1570_v19  ;;  %v1620_v51 = vand.u32 2147483647, %v3423_v5  ;;  %v1622_v53 = vand.u32 2147483648, %v3423_v5 }
 0x18d   :  { %2087 = vrcp.f32 %v3423_v5  ;;  %v3509_v49 = vsel %vm3437_vm13, %v1578_v22, %v1574_v38  ;;  %vm1616_vm13 = vweird.f32 %v3423_v5  ;;  %vm1631_vm15 = vweird.f32 %v3425_v8 }
 0x18e   :  { %2089 = vrcp.f32 %v3425_v8  ;;  %v1635_v61 = vand.u32 2147483647, %v3425_v8  ;;  %v1637_v62 = vand.u32 2147483648, %v3425_v8  ;;  %v1694_v0 = vrot.slane %v3509_v49, 7 }
 0x18f   :  { %vm3545_vm9 = vcmp.eq.f32.partialorder %v1620_v51, 8.507059e+37  ;;  %v1623_v6 = vor.u32 1.1754944e-38, %v1622_v53 }
 0x190   :  { %vm1636_vm7 = vcmp.eq.f32.partialorder %v1635_v61, 8.507059e+37  ;;  %v1715_v31 = vsel %vm1701_vm0, %v1564_v28, %v1694_v0 }
 0x191   :  { %v2084_v17 = vpop.eup %2083 }
 0x192   :  { %v2086_v23 = vpop.eup %2085  ;;  %v3460_v29 = vadd.f32 1.0, %v2084_v17 }
 0x193   :  { %v3462_v30 = vpop.eup %2087  ;;  %v3469_v26 = vadd.f32 1.0, %v2086_v23 }
 0x194   :  { %v3471_v34 = vpop.eup %2089  ;;  %v1612_v18 = vmul.f32 %v3462_v30, %v3423_v5  ;;  %2091 = vrcp.f32 %v3460_v29  ;;  %vm1617_vm14 = vweird.f32 %v3462_v30  ;;  %v1695_v5 = vrot.slane %v3513_v42, 6 }
 0x195   :  { %v1627_v36 = vmul.f32 %v3471_v34, %v3425_v8  ;;  %2093 = vrcp.f32 %v3469_v26  ;;  %vm1632_vm1 = vweird.f32 %v3471_v34  ;;  %vm3541_vm8 = vmor %vm1616_vm13, %vm1617_vm14  ;;  %v1650_v41 = vand.u32 2147483647, %v3460_v29 }
 0x196   :  { %v1613_v43 = vsub.f32 1.0, %v1612_v18  ;;  %vm3553_vm11 = vmor %vm1631_vm15, %vm1632_vm1  ;;  %v1652_v9 = vand.u32 2147483648, %v3460_v29  ;;  %v1638_v8 = vor.u32 1.1754944e-38, %v1637_v62  ;;  %v1665_v14 = vand.u32 2147483647, %v3469_v26 }
 0x197   :  { %v1628_v47 = vsub.f32 1.0, %v1627_v36  ;;  %v1667_v15 = vand.u32 2147483648, %v3469_v26  ;;  %vm1646_vm13 = vweird.f32 %v3460_v29  ;;  %vm1651_vm1 = vcmp.eq.f32.partialorder %v1650_v41, 8.507059e+37 }
 0x198   :  { %v1614_v48 = vmul.f32 %v3462_v30, %v1613_v43  ;;  %v1653_v19 = vor.u32 1.1754944e-38, %v1652_v9  ;;  %vm1666_vm6 = vcmp.eq.f32.partialorder %v1665_v14, 8.507059e+37  ;;  %v1716_v35 = vsel %vm1703_vm2, %v1695_v5, %v1696_v20 }
 0x199   :  { %v1629_v54 = vmul.f32 %v3471_v34, %v1628_v47  ;;  %v1668_v25 = vor.u32 1.1754944e-38, %v1667_v15  ;;  %v1717_v37 = vsel %vm1705_vm4, %v1715_v31, %v1716_v35 }
 0x19a   :  { %v2092_v57 = vpop.eup %2091  ;;  %v1615_v58 = vadd.f32 %v3462_v30, %v1614_v48 }
 0x19b   :  { %v1630_v59 = vadd.f32 %v3471_v34, %v1629_v54  ;;  %v1642_v52 = vmul.f32 %v2092_v57, %v3460_v29  ;;  %v2094_v60 = vpop.eup %2093  ;;  %vm1647_vm12 = vweird.f32 %v2092_v57 }
 0x19c   :  { %v1657_v4 = vmul.f32 %v2094_v60, %v3469_v26  ;;  %v1619_v12 = vsel %vm3541_vm8, %v3462_v30, %v1615_v58  ;;  %vm1662_vm14 = vweird.f32 %v2094_v60  ;;  %vm1648_vm15 = vmor %vm1646_vm13, %vm1647_vm12  ;;  %vm1661_vm8 = vweird.f32 %v3469_v26 }
 0x19d   :  { %v1643_v3 = vsub.f32 1.0, %v1642_v52  ;;  %v1634_v13 = vsel %vm3553_vm11, %v3471_v34, %v1630_v59  ;;  %v1624_v21 = vsel %vm3545_vm9, %v1623_v6, %v1619_v12  ;;  %vm1663_vm11 = vmor %vm1661_vm8, %vm1662_vm14 }
 0x19e   :  { %v1658_v11 = vsub.f32 1.0, %v1657_v4  ;;  %v1639_v22 = vsel %vm1636_vm7, %v1638_v8, %v1634_v13  ;;  %v1697_v32 = vrot.slane %v1624_v21, 4 }
 0x19f   :  { %v1644_v10 = vmul.f32 %v2092_v57, %v1643_v3  ;;  %v1698_v33 = vrot.slane %v1639_v22, 3 }
 0x1a0   :  { %v1659_v17 = vmul.f32 %v2094_v60, %v1658_v11 }
 0x1a1   :  { %v1645_v16 = vadd.f32 %v2092_v57, %v1644_v10  ;;  %v1718_v26 = vsel %vm1707_vm3, %v1697_v32, %v1698_v33 }
 0x1a2   :  { %v1660_v23 = vadd.f32 %v2094_v60, %v1659_v17 }
 0x1a3   :  { %v1649_v24 = vsel %vm1648_vm15, %v2092_v57, %v1645_v16 }
 0x1a4   :  { %v1654_v29 = vsel %vm1651_vm1, %v1653_v19, %v1649_v24  ;;  %v1664_v30 = vsel %vm1663_vm11, %v2094_v60, %v1660_v23 }
 0x1a5   :  { %v1699_v34 = vrot.slane %v1654_v29, 2  ;;  %v1669_v27 = vsel %vm1666_vm6, %v1668_v25, %v1664_v30  ;;  %vm3635_vm6 = vcmask 1043456  }
 0x1a6   :  { %v1700_v18 = vrot.slane %v1669_v27, 1 }
 0x1a8   :  { %v1719_v36 = vsel %vm1709_vm5, %v1699_v34, %v1700_v18 }
 0x1a9   :  { %v1720_v38 = vsel %vm3634_vm10, %v1718_v26, %v1719_v36 }
 0x1aa   :  { %v1721_v39 = vsel %vm3635_vm6, %v1717_v37, %v1720_v38 }
 0x1ab   :  { %1725 = vst [vmem:[#allocation3 + $0x8] sm:$0xff] %v1721_v39 }
 0x1ac   :  { %1736 = dma.vmem_to_hbm [thread:$0]  %s1732_s27, 256, %s1734_s30, [#allocation4]  }
 0x1ad   :  { %2119 = dma.done.wait [#allocation4], 256  }
 0x1ae   :  { %2120 = vsyncadd [#allocation4], 4294967040 }
 0x1af   :  { %1741 = vsyncpa [#allocation4], 1 }

</bundles_post_ra>
